<compile_context>
chip_gen: v6e
topology: v6e:2x2x1
jax: 0.10.0
libtpu: 0.0.40
codegen_flags: <defaults>
</compile_context>

<pallas_src>
import math
from functools import partial

import jax
import jax.numpy as jnp
import numpy as np
from jax.experimental import pallas as pl
from jax.experimental.pallas import tpu as pltpu

D_MODEL = 32


def _eaa_kernel(q_ref, kT_ref, v_ref, wqT_ref, wk_ref, wvT_ref,
                bqk_ref, bv_ref, wc_ref, o_ref, kpT_scr, vp_scr,
                *, d_model, tile_k, n_kc):
    # ---- Hoisted per-batch K/V projections (only at the first query tile). ----
    @pl.when(pl.program_id(1) == 0)
    def _():
        # kp^T = Wk @ K^T  (bk is folded into the query-side bias);
        # keys live on the lane axis for the lane-dense tanh phase below.
        kpT_scr[...] = jnp.dot(wk_ref[...], kT_ref[...],
                               preferred_element_type=jnp.float32)
        vp_scr[...] = jnp.dot(v_ref[...], wvT_ref[...],
                              preferred_element_type=jnp.float32) + bv_ref[...]

    # ---- Per-tile query projection (MXU). ----
    q = q_ref[...].astype(jnp.float32)                                 # (Tq, D)
    qp = jnp.dot(q, wqT_ref[...],
                 preferred_element_type=jnp.float32) + bqk_ref[...]    # (Tq, D)

    tq = q.shape[0]
    m = jnp.full((tq, 1), -jnp.inf, jnp.float32)
    l = jnp.zeros((tq, 1), jnp.float32)
    acc = jnp.zeros((tq, d_model), jnp.float32)

    # ---- Key-chunked, lane-dense score accumulation + online softmax. ----
    for c in range(n_kc):
        k0 = c * tile_k
        kpT_c = kpT_scr[:, k0:k0 + tile_k]                             # (D, tile_k)
        s = jnp.zeros((tq, tile_k), jnp.float32)
        for d in range(d_model):
            # lane-dense (Tq, tile_k) tanh tile; folded per-d weight from SMEM.
            s = s + wc_ref[d] * jnp.tanh(qp[:, d:d + 1] + kpT_c[d:d + 1, :])
        m_new = jnp.maximum(m, jnp.max(s, axis=-1, keepdims=True))
        alpha = jnp.exp(m - m_new)
        p = jnp.exp(s - m_new)
        l = alpha * l + jnp.sum(p, axis=-1, keepdims=True)
        acc = alpha * acc + jnp.dot(p, vp_scr[k0:k0 + tile_k, :],
                                    preferred_element_type=jnp.float32)
        m = m_new

    # TODO(synk): attention dropout is identity in eval mode; train-mode RNG
    # dropout is not implemented in the kernel.
    inv = pl.reciprocal(l, approx=True)
    inv = inv * (2.0 - l * inv)            # one Newton step -> ~f32 accuracy
    o_ref[...] = (acc * inv).astype(o_ref.dtype)


def _pick_tiles(lq, lk):
    """Pick (tile_q, tile_k): keys chunked to bound the lane extent, query tile
    sized so the (tile_q, tile_k) score accumulator (+ one temp) stays small."""
    tile_k = lk
    if lk > 512:
        for t in range(512, 127, -1):          # prefer lane-aligned chunks
            if lk % t == 0 and t % 128 == 0:
                tile_k = t
                break
        else:
            for t in range(512, 7, -1):
                if lk % t == 0 and t % 8 == 0:
                    tile_k = t
                    break
    rows = max(8, 16384 // max(tile_k, 1))     # ~2 * tile_q*tile_k*4B <= 128KB
    valid = [t for t in range(1, lq + 1)
             if lq % t == 0 and (t % 8 == 0 or t == lq)]
    fits = [t for t in valid if t <= rows]
    tile_q = max(fits) if fits else min(valid)
    return tile_q, tile_k


def _vmem_limit_bytes():
    cap = 128 << 20
    try:
        info = pltpu.get_tpu_info()
        cap = int(getattr(info, "vmem_capacity_bytes", cap))
    except Exception:
        pass
    # ~half of physical, capped at 64 MiB (v7x has only 64 MiB physical VMEM).
    return max(32 << 20, min(cap // 2, 64 << 20))


def efficient_additive_attention(query, key, value, params, *, tile_q=None):
    """query/key/value: (B, L, D) float32. Returns (B, Lq, D) float32."""
    B, Lq, D = query.shape
    _, Lk, _ = key.shape
    scale = math.sqrt(D)

    tq_auto, tile_k = _pick_tiles(Lq, Lk)
    if tile_q is None:
        tile_q = tq_auto
    assert Lq % tile_q == 0 and Lk % tile_k == 0
    n_kc = Lk // tile_k

    # Wrapper-side layout / algebraic folding.
    key_t = jnp.swapaxes(key, 1, 2)                       # (B, D, Lk): keys on lanes
    wq_t = params["wq"].T                                 # (D, D)
    wk = params["wk"]                                     # (D, D) untransposed
    wv_t = params["wv"].T                                 # (D, D)
    bqk = (params["bq"] + params["bk"]).reshape(1, D).astype(jnp.float32)
    bv = params["bv"].reshape(1, D).astype(jnp.float32)
    # Fold base (1/scale) + delta + sigma + theta heads into one weight vector;
    # their scalar biases cancel in the softmax and are dropped.
    w_comb = (jnp.full((D,), 1.0 / scale, jnp.float32)
              + params["w_delta"][0] + params["w_sigma"][0]
              + params["w_theta"][0]).astype(jnp.float32)            # (D,) -> SMEM

    grid = (B, Lq // tile_q)
    full2 = lambda b, qi: (0, 0)

    flops = 2 * B * (Lq + 2 * Lk) * D * D + 6 * B * Lq * Lk * D
    trans = B * Lq * Lk * D + 2 * B * Lq * Lk
    bytes_accessed = 4 * (query.size + key.size + value.size + B * Lq * D)

    kernel = partial(_eaa_kernel, d_model=D, tile_k=tile_k, n_kc=n_kc)

    out = pl.pallas_call(
        kernel,
        out_shape=jax.ShapeDtypeStruct((B, Lq, D), jnp.float32),
        grid=grid,
        in_specs=[
            pl.BlockSpec((None, tile_q, D), lambda b, qi: (b, qi, 0)),   # query tile
            pl.BlockSpec((None, D, Lk), lambda b, qi: (b, 0, 0)),        # key^T (dedup'd over qi)
            pl.BlockSpec((None, Lk, D), lambda b, qi: (b, 0, 0)),        # value (dedup'd over qi)
            pl.BlockSpec((D, D), full2),                                 # Wq^T
            pl.BlockSpec((D, D), full2),                                 # Wk
            pl.BlockSpec((D, D), full2),                                 # Wv^T
            pl.BlockSpec((1, D), full2),                                 # bq + bk
            pl.BlockSpec((1, D), full2),                                 # bv
            pl.BlockSpec(memory_space=pltpu.MemorySpace.SMEM),           # folded score weights
        ],
        out_specs=pl.BlockSpec((None, tile_q, D), lambda b, qi: (b, qi, 0)),
        scratch_shapes=[
            pltpu.VMEM((D, Lk), jnp.float32),     # kp^T, carried across query tiles
            pltpu.VMEM((Lk, D), jnp.float32),     # vp,   carried across query tiles
        ],
        compiler_params=pltpu.CompilerParams(
            dimension_semantics=("parallel", "arbitrary"),
            vmem_limit_bytes=_vmem_limit_bytes()),
        cost_estimate=pl.CostEstimate(flops=int(flops),
                                      transcendentals=int(trans),
                                      bytes_accessed=int(bytes_accessed)),
    )(query, key_t, value, wq_t, wk, wv_t, bqk, bv, w_comb)

    return out


def _reference(query, key, value, params):
    """Pure-JAX mirror of the PyTorch forward (eval mode: dropout = identity)."""
    D = query.shape[-1]
    scale = math.sqrt(D)
    Q = query @ params["wq"].T + params["bq"]
    K = key @ params["wk"].T + params["bk"]
    V = value @ params["wv"].T + params["bv"]
    e = jnp.tanh(Q[:, :, None, :] + K[:, None, :, :])             # (B, Lq, Lk, D)
    base = e.sum(-1) / scale
    delta = jnp.squeeze(e @ params["w_delta"].T, -1) + params["b_delta"][0]
    sigma = jnp.squeeze(e @ params["w_sigma"].T, -1) + params["b_sigma"][0]
    theta = jnp.squeeze(e @ params["w_theta"].T, -1) + params["b_theta"][0]
    combined = base + delta + sigma + theta
    attn = jax.nn.softmax(combined, axis=-1)
    return attn @ V


def _init_params(key, d_model=D_MODEL):
    """nn.Linear-style uniform(-1/sqrt(fan_in), 1/sqrt(fan_in)) init."""
    ks = jax.random.split(key, 12)
    b = 1.0 / np.sqrt(d_model)
    u = lambda k, shape: jax.random.uniform(k, shape, jnp.float32, -b, b)
    return {
        "wq": u(ks[0], (d_model, d_model)), "bq": u(ks[1], (d_model,)),
        "wk": u(ks[2], (d_model, d_model)), "bk": u(ks[3], (d_model,)),
        "wv": u(ks[4], (d_model, d_model)), "bv": u(ks[5], (d_model,)),
        "w_delta": u(ks[6], (1, d_model)), "b_delta": u(ks[7], (1,)),
        "w_sigma": u(ks[8], (1, d_model)), "b_sigma": u(ks[9], (1,)),
        "w_theta": u(ks[10], (1, d_model)), "b_theta": u(ks[11], (1,)),
    }


if __name__ == "__main__":
    root = jax.random.PRNGKey(0)
    pkey, qk, kk, vk = jax.random.split(root, 4)
    params = _init_params(pkey, D_MODEL)

    B, L = 2, 8
    q = jax.random.normal(qk, (B, L, D_MODEL), jnp.float32)
    k = jax.random.normal(kk, (B, L, D_MODEL), jnp.float32)
    v = jax.random.normal(vk, (B, L, D_MODEL), jnp.float32)

    out = efficient_additive_attention(q, k, v, params)
    out = jax.block_until_ready(out)

    ref = _reference(q, k, v, params)
    np.testing.assert_allclose(np.asarray(out), np.asarray(ref),
                               rtol=1e-4, atol=1e-4)
    print("KERNEL_OK")
</pallas_src>

<mosaic_0001>
module attributes {stable_mosaic.version = 11 : i64} {
  func.func @_eaa_kernel(%arg0: i32, %arg1: i32, %arg2: memref<1x8x32xf32, #tpu.memory_space<vmem>>, %arg3: memref<1x32x8xf32, #tpu.memory_space<vmem>>, %arg4: memref<1x8x32xf32, #tpu.memory_space<vmem>>, %arg5: memref<32x32xf32, #tpu.memory_space<vmem>>, %arg6: memref<32x32xf32, #tpu.memory_space<vmem>>, %arg7: memref<32x32xf32, #tpu.memory_space<vmem>>, %arg8: memref<1x32xf32, #tpu.memory_space<vmem>>, %arg9: memref<1x32xf32, #tpu.memory_space<vmem>>, %arg10: memref<32xf32, #tpu.memory_space<smem>>, %arg11: memref<1x8x32xf32, #tpu.memory_space<vmem>>, %arg12: memref<32x8xf32, #tpu.memory_space<vmem>>, %arg13: memref<8x32xf32, #tpu.memory_space<vmem>>) attributes {dimension_semantics = [#tpu.dimension_semantics<parallel>, #tpu.dimension_semantics<arbitrary>], iteration_bounds = array<i64: 2, 1>, scalar_prefetch = 0 : i64, scratch_operands = 2 : i64, tpu.core_type = #tpu.core_type<tc>, window_params = [{transform_indices = @transform_0, window_bounds = array<i64: 1, 8, 32>}, {transform_indices = @transform_1, window_bounds = array<i64: 1, 32, 8>}, {transform_indices = @transform_2, window_bounds = array<i64: 1, 8, 32>}, {pipeline_mode = #tpu.pipeline_mode<synchronous>, transform_indices = @transform_3, window_bounds = array<i64: 32, 32>}, {pipeline_mode = #tpu.pipeline_mode<synchronous>, transform_indices = @transform_4, window_bounds = array<i64: 32, 32>}, {pipeline_mode = #tpu.pipeline_mode<synchronous>, transform_indices = @transform_5, window_bounds = array<i64: 32, 32>}, {pipeline_mode = #tpu.pipeline_mode<synchronous>, transform_indices = @transform_6, window_bounds = array<i64: 1, 32>}, {pipeline_mode = #tpu.pipeline_mode<synchronous>, transform_indices = @transform_7, window_bounds = array<i64: 1, 32>}, {transform_indices = @transform_8, window_bounds = array<i64: 32>}, {transform_indices = @transform_9, window_bounds = array<i64: 1, 8, 32>}]} {
    %c0_i32 = arith.constant 0 : i32
    %0 = arith.cmpi eq, %arg1, %c0_i32 : i32
    %1 = arith.extui %0 : i1 to i32
    %c0_i32_0 = arith.constant 0 : i32
    %2 = arith.cmpi ne, %1, %c0_i32_0 : i32
    scf.if %2 {
      %c0_23 = arith.constant 0 : index
      %c0_24 = arith.constant 0 : index
      %362 = vector.load %arg6[%c0_23, %c0_24] : memref<32x32xf32, #tpu.memory_space<vmem>>, vector<32x32xf32>
      %c0_25 = arith.constant 0 : index
      %c0_26 = arith.constant 0 : index
      %c0_27 = arith.constant 0 : index
      %363 = vector.load %arg3[%c0_25, %c0_26, %c0_27] : memref<1x32x8xf32, #tpu.memory_space<vmem>>, vector<1x32x8xf32>
      %364 = vector.shape_cast %363 : vector<1x32x8xf32> to vector<32x8xf32>
      %cst_28 = arith.constant dense<0.000000e+00> : vector<32x8xf32>
      %365 = tpu.matmul %362, %364, %cst_28 {dimension_numbers = #tpu.dot_dimension_numbers<[1], [0], [0], [1], [0, 0, 1, 1], [], []>} : vector<32x32xf32>, vector<32x8xf32>, vector<32x8xf32> -> vector<32x8xf32>
      %c0_29 = arith.constant 0 : index
      %c0_30 = arith.constant 0 : index
      %366 = vector.load %arg12[%c0_29, %c0_30] : memref<32x8xf32, #tpu.memory_space<vmem>>, vector<32x8xf32>
      tpu.vector_store %arg12[%c0_29, %c0_30], %365 {strides = array<i32>} : memref<32x8xf32, #tpu.memory_space<vmem>>, vector<32x8xf32>,
      %c0_31 = arith.constant 0 : index
      %c0_32 = arith.constant 0 : index
      %c0_33 = arith.constant 0 : index
      %367 = vector.load %arg4[%c0_31, %c0_32, %c0_33] : memref<1x8x32xf32, #tpu.memory_space<vmem>>, vector<1x8x32xf32>
      %368 = vector.shape_cast %367 : vector<1x8x32xf32> to vector<8x32xf32>
      %c0_34 = arith.constant 0 : index
      %c0_35 = arith.constant 0 : index
      %369 = vector.load %arg7[%c0_34, %c0_35] : memref<32x32xf32, #tpu.memory_space<vmem>>, vector<32x32xf32>
      %cst_36 = arith.constant dense<0.000000e+00> : vector<8x32xf32>
      %370 = tpu.matmul %368, %369, %cst_36 {dimension_numbers = #tpu.dot_dimension_numbers<[1], [0], [0], [1], [0, 0, 1, 1], [], []>} : vector<8x32xf32>, vector<32x32xf32>, vector<8x32xf32> -> vector<8x32xf32>
      %c0_37 = arith.constant 0 : index
      %c0_38 = arith.constant 0 : index
      %371 = vector.load %arg9[%c0_37, %c0_38] : memref<1x32xf32, #tpu.memory_space<vmem>>, vector<1x32xf32>
      %372 = vector.broadcast %371 : vector<1x32xf32> to vector<8x32xf32>
      %373 = arith.addf %370, %372 : vector<8x32xf32>
      %c0_39 = arith.constant 0 : index
      %c0_40 = arith.constant 0 : index
      %374 = vector.load %arg13[%c0_39, %c0_40] : memref<8x32xf32, #tpu.memory_space<vmem>>, vector<8x32xf32>
      tpu.vector_store %arg13[%c0_39, %c0_40], %373 {strides = array<i32>} : memref<8x32xf32, #tpu.memory_space<vmem>>, vector<8x32xf32>,
    } else {
    }
    %c0 = arith.constant 0 : index
    %c0_1 = arith.constant 0 : index
    %c0_2 = arith.constant 0 : index
    %3 = vector.load %arg2[%c0, %c0_1, %c0_2] : memref<1x8x32xf32, #tpu.memory_space<vmem>>, vector<1x8x32xf32>
    %4 = vector.shape_cast %3 : vector<1x8x32xf32> to vector<8x32xf32>
    %c0_3 = arith.constant 0 : index
    %c0_4 = arith.constant 0 : index
    %5 = vector.load %arg5[%c0_3, %c0_4] : memref<32x32xf32, #tpu.memory_space<vmem>>, vector<32x32xf32>
    %cst = arith.constant dense<0.000000e+00> : vector<8x32xf32>
    %6 = tpu.matmul %4, %5, %cst {dimension_numbers = #tpu.dot_dimension_numbers<[1], [0], [0], [1], [0, 0, 1, 1], [], []>} : vector<8x32xf32>, vector<32x32xf32>, vector<8x32xf32> -> vector<8x32xf32>
    %c0_5 = arith.constant 0 : index
    %c0_6 = arith.constant 0 : index
    %7 = vector.load %arg8[%c0_5, %c0_6] : memref<1x32xf32, #tpu.memory_space<vmem>>, vector<1x32xf32>
    %8 = vector.broadcast %7 : vector<1x32xf32> to vector<8x32xf32>
    %9 = arith.addf %6, %8 : vector<8x32xf32>
    %cst_7 = arith.constant 0xFF800000 : f32
    %10 = vector.broadcast %cst_7 : f32 to vector<8x1xf32>
    %cst_8 = arith.constant 0.000000e+00 : f32
    %11 = vector.broadcast %cst_8 : f32 to vector<8x1xf32>
    %cst_9 = arith.constant 0.000000e+00 : f32
    %12 = vector.broadcast %cst_9 : f32 to vector<8x32xf32>
    %c0_10 = arith.constant 0 : index
    %c0_11 = arith.constant 0 : index
    %13 = vector.load %arg12[%c0_10, %c0_11] : memref<32x8xf32, #tpu.memory_space<vmem>>, vector<32x8xf32>
    %cst_12 = arith.constant 0.000000e+00 : f32
    %14 = vector.broadcast %cst_12 : f32 to vector<8x8xf32>
    %c0_13 = arith.constant 0 : index
    %15 = memref.load %arg10[%c0_13] : memref<32xf32, #tpu.memory_space<smem>>
    %16 = vector.extract_strided_slice %9 {offsets = [0, 0], sizes = [8, 1], strides = [1, 1]} : vector<8x32xf32> to vector<8x1xf32>
    %17 = vector.extract_strided_slice %13 {offsets = [0, 0], sizes = [1, 8], strides = [1, 1]} : vector<32x8xf32> to vector<1x8xf32>
    %18 = vector.broadcast %16 : vector<8x1xf32> to vector<8x8xf32>
    %19 = vector.broadcast %17 : vector<1x8xf32> to vector<8x8xf32>
    %20 = arith.addf %18, %19 : vector<8x8xf32>
    %21 = math.tanh %20 : vector<8x8xf32>
    %22 = vector.broadcast %15 : f32 to vector<8x8xf32>
    %23 = arith.mulf %22, %21 : vector<8x8xf32>
    %24 = arith.addf %14, %23 : vector<8x8xf32>
    %c1 = arith.constant 1 : index
    %25 = memref.load %arg10[%c1] : memref<32xf32, #tpu.memory_space<smem>>
    %26 = vector.extract_strided_slice %9 {offsets = [0, 1], sizes = [8, 1], strides = [1, 1]} : vector<8x32xf32> to vector<8x1xf32>
    %27 = vector.extract_strided_slice %13 {offsets = [1, 0], sizes = [1, 8], strides = [1, 1]} : vector<32x8xf32> to vector<1x8xf32>
    %28 = vector.broadcast %26 : vector<8x1xf32> to vector<8x8xf32>
    %29 = vector.broadcast %27 : vector<1x8xf32> to vector<8x8xf32>
    %30 = arith.addf %28, %29 : vector<8x8xf32>
    %31 = math.tanh %30 : vector<8x8xf32>
    %32 = vector.broadcast %25 : f32 to vector<8x8xf32>
    %33 = arith.mulf %32, %31 : vector<8x8xf32>
    %34 = arith.addf %24, %33 : vector<8x8xf32>
    %c2 = arith.constant 2 : index
    %35 = memref.load %arg10[%c2] : memref<32xf32, #tpu.memory_space<smem>>
    %36 = vector.extract_strided_slice %9 {offsets = [0, 2], sizes = [8, 1], strides = [1, 1]} : vector<8x32xf32> to vector<8x1xf32>
    %37 = vector.extract_strided_slice %13 {offsets = [2, 0], sizes = [1, 8], strides = [1, 1]} : vector<32x8xf32> to vector<1x8xf32>
    %38 = vector.broadcast %36 : vector<8x1xf32> to vector<8x8xf32>
    %39 = vector.broadcast %37 : vector<1x8xf32> to vector<8x8xf32>
    %40 = arith.addf %38, %39 : vector<8x8xf32>
    %41 = math.tanh %40 : vector<8x8xf32>
    %42 = vector.broadcast %35 : f32 to vector<8x8xf32>
    %43 = arith.mulf %42, %41 : vector<8x8xf32>
    %44 = arith.addf %34, %43 : vector<8x8xf32>
    %c3 = arith.constant 3 : index
    %45 = memref.load %arg10[%c3] : memref<32xf32, #tpu.memory_space<smem>>
    %46 = vector.extract_strided_slice %9 {offsets = [0, 3], sizes = [8, 1], strides = [1, 1]} : vector<8x32xf32> to vector<8x1xf32>
    %47 = vector.extract_strided_slice %13 {offsets = [3, 0], sizes = [1, 8], strides = [1, 1]} : vector<32x8xf32> to vector<1x8xf32>
    %48 = vector.broadcast %46 : vector<8x1xf32> to vector<8x8xf32>
    %49 = vector.broadcast %47 : vector<1x8xf32> to vector<8x8xf32>
    %50 = arith.addf %48, %49 : vector<8x8xf32>
    %51 = math.tanh %50 : vector<8x8xf32>
    %52 = vector.broadcast %45 : f32 to vector<8x8xf32>
    %53 = arith.mulf %52, %51 : vector<8x8xf32>
    %54 = arith.addf %44, %53 : vector<8x8xf32>
    %c4 = arith.constant 4 : index
    %55 = memref.load %arg10[%c4] : memref<32xf32, #tpu.memory_space<smem>>
    %56 = vector.extract_strided_slice %9 {offsets = [0, 4], sizes = [8, 1], strides = [1, 1]} : vector<8x32xf32> to vector<8x1xf32>
    %57 = vector.extract_strided_slice %13 {offsets = [4, 0], sizes = [1, 8], strides = [1, 1]} : vector<32x8xf32> to vector<1x8xf32>
    %58 = vector.broadcast %56 : vector<8x1xf32> to vector<8x8xf32>
    %59 = vector.broadcast %57 : vector<1x8xf32> to vector<8x8xf32>
    %60 = arith.addf %58, %59 : vector<8x8xf32>
    %61 = math.tanh %60 : vector<8x8xf32>
    %62 = vector.broadcast %55 : f32 to vector<8x8xf32>
    %63 = arith.mulf %62, %61 : vector<8x8xf32>
    %64 = arith.addf %54, %63 : vector<8x8xf32>
    %c5 = arith.constant 5 : index
    %65 = memref.load %arg10[%c5] : memref<32xf32, #tpu.memory_space<smem>>
    %66 = vector.extract_strided_slice %9 {offsets = [0, 5], sizes = [8, 1], strides = [1, 1]} : vector<8x32xf32> to vector<8x1xf32>
    %67 = vector.extract_strided_slice %13 {offsets = [5, 0], sizes = [1, 8], strides = [1, 1]} : vector<32x8xf32> to vector<1x8xf32>
    %68 = vector.broadcast %66 : vector<8x1xf32> to vector<8x8xf32>
    %69 = vector.broadcast %67 : vector<1x8xf32> to vector<8x8xf32>
    %70 = arith.addf %68, %69 : vector<8x8xf32>
    %71 = math.tanh %70 : vector<8x8xf32>
    %72 = vector.broadcast %65 : f32 to vector<8x8xf32>
    %73 = arith.mulf %72, %71 : vector<8x8xf32>
    %74 = arith.addf %64, %73 : vector<8x8xf32>
    %c6 = arith.constant 6 : index
    %75 = memref.load %arg10[%c6] : memref<32xf32, #tpu.memory_space<smem>>
    %76 = vector.extract_strided_slice %9 {offsets = [0, 6], sizes = [8, 1], strides = [1, 1]} : vector<8x32xf32> to vector<8x1xf32>
    %77 = vector.extract_strided_slice %13 {offsets = [6, 0], sizes = [1, 8], strides = [1, 1]} : vector<32x8xf32> to vector<1x8xf32>
    %78 = vector.broadcast %76 : vector<8x1xf32> to vector<8x8xf32>
    %79 = vector.broadcast %77 : vector<1x8xf32> to vector<8x8xf32>
    %80 = arith.addf %78, %79 : vector<8x8xf32>
    %81 = math.tanh %80 : vector<8x8xf32>
    %82 = vector.broadcast %75 : f32 to vector<8x8xf32>
    %83 = arith.mulf %82, %81 : vector<8x8xf32>
    %84 = arith.addf %74, %83 : vector<8x8xf32>
    %c7 = arith.constant 7 : index
    %85 = memref.load %arg10[%c7] : memref<32xf32, #tpu.memory_space<smem>>
    %86 = vector.extract_strided_slice %9 {offsets = [0, 7], sizes = [8, 1], strides = [1, 1]} : vector<8x32xf32> to vector<8x1xf32>
    %87 = vector.extract_strided_slice %13 {offsets = [7, 0], sizes = [1, 8], strides = [1, 1]} : vector<32x8xf32> to vector<1x8xf32>
    %88 = vector.broadcast %86 : vector<8x1xf32> to vector<8x8xf32>
    %89 = vector.broadcast %87 : vector<1x8xf32> to vector<8x8xf32>
    %90 = arith.addf %88, %89 : vector<8x8xf32>
    %91 = math.tanh %90 : vector<8x8xf32>
    %92 = vector.broadcast %85 : f32 to vector<8x8xf32>
    %93 = arith.mulf %92, %91 : vector<8x8xf32>
    %94 = arith.addf %84, %93 : vector<8x8xf32>
    %c8 = arith.constant 8 : index
    %95 = memref.load %arg10[%c8] : memref<32xf32, #tpu.memory_space<smem>>
    %96 = vector.extract_strided_slice %9 {offsets = [0, 8], sizes = [8, 1], strides = [1, 1]} : vector<8x32xf32> to vector<8x1xf32>
    %97 = vector.extract_strided_slice %13 {offsets = [8, 0], sizes = [1, 8], strides = [1, 1]} : vector<32x8xf32> to vector<1x8xf32>
    %98 = vector.broadcast %96 : vector<8x1xf32> to vector<8x8xf32>
    %99 = vector.broadcast %97 : vector<1x8xf32> to vector<8x8xf32>
    %100 = arith.addf %98, %99 : vector<8x8xf32>
    %101 = math.tanh %100 : vector<8x8xf32>
    %102 = vector.broadcast %95 : f32 to vector<8x8xf32>
    %103 = arith.mulf %102, %101 : vector<8x8xf32>
    %104 = arith.addf %94, %103 : vector<8x8xf32>
    %c9 = arith.constant 9 : index
    %105 = memref.load %arg10[%c9] : memref<32xf32, #tpu.memory_space<smem>>
    %106 = vector.extract_strided_slice %9 {offsets = [0, 9], sizes = [8, 1], strides = [1, 1]} : vector<8x32xf32> to vector<8x1xf32>
    %107 = vector.extract_strided_slice %13 {offsets = [9, 0], sizes = [1, 8], strides = [1, 1]} : vector<32x8xf32> to vector<1x8xf32>
    %108 = vector.broadcast %106 : vector<8x1xf32> to vector<8x8xf32>
    %109 = vector.broadcast %107 : vector<1x8xf32> to vector<8x8xf32>
    %110 = arith.addf %108, %109 : vector<8x8xf32>
    %111 = math.tanh %110 : vector<8x8xf32>
    %112 = vector.broadcast %105 : f32 to vector<8x8xf32>
    %113 = arith.mulf %112, %111 : vector<8x8xf32>
    %114 = arith.addf %104, %113 : vector<8x8xf32>
    %c10 = arith.constant 10 : index
    %115 = memref.load %arg10[%c10] : memref<32xf32, #tpu.memory_space<smem>>
    %116 = vector.extract_strided_slice %9 {offsets = [0, 10], sizes = [8, 1], strides = [1, 1]} : vector<8x32xf32> to vector<8x1xf32>
    %117 = vector.extract_strided_slice %13 {offsets = [10, 0], sizes = [1, 8], strides = [1, 1]} : vector<32x8xf32> to vector<1x8xf32>
    %118 = vector.broadcast %116 : vector<8x1xf32> to vector<8x8xf32>
    %119 = vector.broadcast %117 : vector<1x8xf32> to vector<8x8xf32>
    %120 = arith.addf %118, %119 : vector<8x8xf32>
    %121 = math.tanh %120 : vector<8x8xf32>
    %122 = vector.broadcast %115 : f32 to vector<8x8xf32>
    %123 = arith.mulf %122, %121 : vector<8x8xf32>
    %124 = arith.addf %114, %123 : vector<8x8xf32>
    %c11 = arith.constant 11 : index
    %125 = memref.load %arg10[%c11] : memref<32xf32, #tpu.memory_space<smem>>
    %126 = vector.extract_strided_slice %9 {offsets = [0, 11], sizes = [8, 1], strides = [1, 1]} : vector<8x32xf32> to vector<8x1xf32>
    %127 = vector.extract_strided_slice %13 {offsets = [11, 0], sizes = [1, 8], strides = [1, 1]} : vector<32x8xf32> to vector<1x8xf32>
    %128 = vector.broadcast %126 : vector<8x1xf32> to vector<8x8xf32>
    %129 = vector.broadcast %127 : vector<1x8xf32> to vector<8x8xf32>
    %130 = arith.addf %128, %129 : vector<8x8xf32>
    %131 = math.tanh %130 : vector<8x8xf32>
    %132 = vector.broadcast %125 : f32 to vector<8x8xf32>
    %133 = arith.mulf %132, %131 : vector<8x8xf32>
    %134 = arith.addf %124, %133 : vector<8x8xf32>
    %c12 = arith.constant 12 : index
    %135 = memref.load %arg10[%c12] : memref<32xf32, #tpu.memory_space<smem>>
    %136 = vector.extract_strided_slice %9 {offsets = [0, 12], sizes = [8, 1], strides = [1, 1]} : vector<8x32xf32> to vector<8x1xf32>
    %137 = vector.extract_strided_slice %13 {offsets = [12, 0], sizes = [1, 8], strides = [1, 1]} : vector<32x8xf32> to vector<1x8xf32>
    %138 = vector.broadcast %136 : vector<8x1xf32> to vector<8x8xf32>
    %139 = vector.broadcast %137 : vector<1x8xf32> to vector<8x8xf32>
    %140 = arith.addf %138, %139 : vector<8x8xf32>
    %141 = math.tanh %140 : vector<8x8xf32>
    %142 = vector.broadcast %135 : f32 to vector<8x8xf32>
    %143 = arith.mulf %142, %141 : vector<8x8xf32>
    %144 = arith.addf %134, %143 : vector<8x8xf32>
    %c13 = arith.constant 13 : index
    %145 = memref.load %arg10[%c13] : memref<32xf32, #tpu.memory_space<smem>>
    %146 = vector.extract_strided_slice %9 {offsets = [0, 13], sizes = [8, 1], strides = [1, 1]} : vector<8x32xf32> to vector<8x1xf32>
    %147 = vector.extract_strided_slice %13 {offsets = [13, 0], sizes = [1, 8], strides = [1, 1]} : vector<32x8xf32> to vector<1x8xf32>
    %148 = vector.broadcast %146 : vector<8x1xf32> to vector<8x8xf32>
    %149 = vector.broadcast %147 : vector<1x8xf32> to vector<8x8xf32>
    %150 = arith.addf %148, %149 : vector<8x8xf32>
    %151 = math.tanh %150 : vector<8x8xf32>
    %152 = vector.broadcast %145 : f32 to vector<8x8xf32>
    %153 = arith.mulf %152, %151 : vector<8x8xf32>
    %154 = arith.addf %144, %153 : vector<8x8xf32>
    %c14 = arith.constant 14 : index
    %155 = memref.load %arg10[%c14] : memref<32xf32, #tpu.memory_space<smem>>
    %156 = vector.extract_strided_slice %9 {offsets = [0, 14], sizes = [8, 1], strides = [1, 1]} : vector<8x32xf32> to vector<8x1xf32>
    %157 = vector.extract_strided_slice %13 {offsets = [14, 0], sizes = [1, 8], strides = [1, 1]} : vector<32x8xf32> to vector<1x8xf32>
    %158 = vector.broadcast %156 : vector<8x1xf32> to vector<8x8xf32>
    %159 = vector.broadcast %157 : vector<1x8xf32> to vector<8x8xf32>
    %160 = arith.addf %158, %159 : vector<8x8xf32>
    %161 = math.tanh %160 : vector<8x8xf32>
    %162 = vector.broadcast %155 : f32 to vector<8x8xf32>
    %163 = arith.mulf %162, %161 : vector<8x8xf32>
    %164 = arith.addf %154, %163 : vector<8x8xf32>
    %c15 = arith.constant 15 : index
    %165 = memref.load %arg10[%c15] : memref<32xf32, #tpu.memory_space<smem>>
    %166 = vector.extract_strided_slice %9 {offsets = [0, 15], sizes = [8, 1], strides = [1, 1]} : vector<8x32xf32> to vector<8x1xf32>
    %167 = vector.extract_strided_slice %13 {offsets = [15, 0], sizes = [1, 8], strides = [1, 1]} : vector<32x8xf32> to vector<1x8xf32>
    %168 = vector.broadcast %166 : vector<8x1xf32> to vector<8x8xf32>
    %169 = vector.broadcast %167 : vector<1x8xf32> to vector<8x8xf32>
    %170 = arith.addf %168, %169 : vector<8x8xf32>
    %171 = math.tanh %170 : vector<8x8xf32>
    %172 = vector.broadcast %165 : f32 to vector<8x8xf32>
    %173 = arith.mulf %172, %171 : vector<8x8xf32>
    %174 = arith.addf %164, %173 : vector<8x8xf32>
    %c16 = arith.constant 16 : index
    %175 = memref.load %arg10[%c16] : memref<32xf32, #tpu.memory_space<smem>>
    %176 = vector.extract_strided_slice %9 {offsets = [0, 16], sizes = [8, 1], strides = [1, 1]} : vector<8x32xf32> to vector<8x1xf32>
    %177 = vector.extract_strided_slice %13 {offsets = [16, 0], sizes = [1, 8], strides = [1, 1]} : vector<32x8xf32> to vector<1x8xf32>
    %178 = vector.broadcast %176 : vector<8x1xf32> to vector<8x8xf32>
    %179 = vector.broadcast %177 : vector<1x8xf32> to vector<8x8xf32>
    %180 = arith.addf %178, %179 : vector<8x8xf32>
    %181 = math.tanh %180 : vector<8x8xf32>
    %182 = vector.broadcast %175 : f32 to vector<8x8xf32>
    %183 = arith.mulf %182, %181 : vector<8x8xf32>
    %184 = arith.addf %174, %183 : vector<8x8xf32>
    %c17 = arith.constant 17 : index
    %185 = memref.load %arg10[%c17] : memref<32xf32, #tpu.memory_space<smem>>
    %186 = vector.extract_strided_slice %9 {offsets = [0, 17], sizes = [8, 1], strides = [1, 1]} : vector<8x32xf32> to vector<8x1xf32>
    %187 = vector.extract_strided_slice %13 {offsets = [17, 0], sizes = [1, 8], strides = [1, 1]} : vector<32x8xf32> to vector<1x8xf32>
    %188 = vector.broadcast %186 : vector<8x1xf32> to vector<8x8xf32>
    %189 = vector.broadcast %187 : vector<1x8xf32> to vector<8x8xf32>
    %190 = arith.addf %188, %189 : vector<8x8xf32>
    %191 = math.tanh %190 : vector<8x8xf32>
    %192 = vector.broadcast %185 : f32 to vector<8x8xf32>
    %193 = arith.mulf %192, %191 : vector<8x8xf32>
    %194 = arith.addf %184, %193 : vector<8x8xf32>
    %c18 = arith.constant 18 : index
    %195 = memref.load %arg10[%c18] : memref<32xf32, #tpu.memory_space<smem>>
    %196 = vector.extract_strided_slice %9 {offsets = [0, 18], sizes = [8, 1], strides = [1, 1]} : vector<8x32xf32> to vector<8x1xf32>
    %197 = vector.extract_strided_slice %13 {offsets = [18, 0], sizes = [1, 8], strides = [1, 1]} : vector<32x8xf32> to vector<1x8xf32>
    %198 = vector.broadcast %196 : vector<8x1xf32> to vector<8x8xf32>
    %199 = vector.broadcast %197 : vector<1x8xf32> to vector<8x8xf32>
    %200 = arith.addf %198, %199 : vector<8x8xf32>
    %201 = math.tanh %200 : vector<8x8xf32>
    %202 = vector.broadcast %195 : f32 to vector<8x8xf32>
    %203 = arith.mulf %202, %201 : vector<8x8xf32>
    %204 = arith.addf %194, %203 : vector<8x8xf32>
    %c19 = arith.constant 19 : index
    %205 = memref.load %arg10[%c19] : memref<32xf32, #tpu.memory_space<smem>>
    %206 = vector.extract_strided_slice %9 {offsets = [0, 19], sizes = [8, 1], strides = [1, 1]} : vector<8x32xf32> to vector<8x1xf32>
    %207 = vector.extract_strided_slice %13 {offsets = [19, 0], sizes = [1, 8], strides = [1, 1]} : vector<32x8xf32> to vector<1x8xf32>
    %208 = vector.broadcast %206 : vector<8x1xf32> to vector<8x8xf32>
    %209 = vector.broadcast %207 : vector<1x8xf32> to vector<8x8xf32>
    %210 = arith.addf %208, %209 : vector<8x8xf32>
    %211 = math.tanh %210 : vector<8x8xf32>
    %212 = vector.broadcast %205 : f32 to vector<8x8xf32>
    %213 = arith.mulf %212, %211 : vector<8x8xf32>
    %214 = arith.addf %204, %213 : vector<8x8xf32>
    %c20 = arith.constant 20 : index
    %215 = memref.load %arg10[%c20] : memref<32xf32, #tpu.memory_space<smem>>
    %216 = vector.extract_strided_slice %9 {offsets = [0, 20], sizes = [8, 1], strides = [1, 1]} : vector<8x32xf32> to vector<8x1xf32>
    %217 = vector.extract_strided_slice %13 {offsets = [20, 0], sizes = [1, 8], strides = [1, 1]} : vector<32x8xf32> to vector<1x8xf32>
    %218 = vector.broadcast %216 : vector<8x1xf32> to vector<8x8xf32>
    %219 = vector.broadcast %217 : vector<1x8xf32> to vector<8x8xf32>
    %220 = arith.addf %218, %219 : vector<8x8xf32>
    %221 = math.tanh %220 : vector<8x8xf32>
    %222 = vector.broadcast %215 : f32 to vector<8x8xf32>
    %223 = arith.mulf %222, %221 : vector<8x8xf32>
    %224 = arith.addf %214, %223 : vector<8x8xf32>
    %c21 = arith.constant 21 : index
    %225 = memref.load %arg10[%c21] : memref<32xf32, #tpu.memory_space<smem>>
    %226 = vector.extract_strided_slice %9 {offsets = [0, 21], sizes = [8, 1], strides = [1, 1]} : vector<8x32xf32> to vector<8x1xf32>
    %227 = vector.extract_strided_slice %13 {offsets = [21, 0], sizes = [1, 8], strides = [1, 1]} : vector<32x8xf32> to vector<1x8xf32>
    %228 = vector.broadcast %226 : vector<8x1xf32> to vector<8x8xf32>
    %229 = vector.broadcast %227 : vector<1x8xf32> to vector<8x8xf32>
    %230 = arith.addf %228, %229 : vector<8x8xf32>
    %231 = math.tanh %230 : vector<8x8xf32>
    %232 = vector.broadcast %225 : f32 to vector<8x8xf32>
    %233 = arith.mulf %232, %231 : vector<8x8xf32>
    %234 = arith.addf %224, %233 : vector<8x8xf32>
    %c22 = arith.constant 22 : index
    %235 = memref.load %arg10[%c22] : memref<32xf32, #tpu.memory_space<smem>>
    %236 = vector.extract_strided_slice %9 {offsets = [0, 22], sizes = [8, 1], strides = [1, 1]} : vector<8x32xf32> to vector<8x1xf32>
    %237 = vector.extract_strided_slice %13 {offsets = [22, 0], sizes = [1, 8], strides = [1, 1]} : vector<32x8xf32> to vector<1x8xf32>
    %238 = vector.broadcast %236 : vector<8x1xf32> to vector<8x8xf32>
    %239 = vector.broadcast %237 : vector<1x8xf32> to vector<8x8xf32>
    %240 = arith.addf %238, %239 : vector<8x8xf32>
    %241 = math.tanh %240 : vector<8x8xf32>
    %242 = vector.broadcast %235 : f32 to vector<8x8xf32>
    %243 = arith.mulf %242, %241 : vector<8x8xf32>
    %244 = arith.addf %234, %243 : vector<8x8xf32>
    %c23 = arith.constant 23 : index
    %245 = memref.load %arg10[%c23] : memref<32xf32, #tpu.memory_space<smem>>
    %246 = vector.extract_strided_slice %9 {offsets = [0, 23], sizes = [8, 1], strides = [1, 1]} : vector<8x32xf32> to vector<8x1xf32>
    %247 = vector.extract_strided_slice %13 {offsets = [23, 0], sizes = [1, 8], strides = [1, 1]} : vector<32x8xf32> to vector<1x8xf32>
    %248 = vector.broadcast %246 : vector<8x1xf32> to vector<8x8xf32>
    %249 = vector.broadcast %247 : vector<1x8xf32> to vector<8x8xf32>
    %250 = arith.addf %248, %249 : vector<8x8xf32>
    %251 = math.tanh %250 : vector<8x8xf32>
    %252 = vector.broadcast %245 : f32 to vector<8x8xf32>
    %253 = arith.mulf %252, %251 : vector<8x8xf32>
    %254 = arith.addf %244, %253 : vector<8x8xf32>
    %c24 = arith.constant 24 : index
    %255 = memref.load %arg10[%c24] : memref<32xf32, #tpu.memory_space<smem>>
    %256 = vector.extract_strided_slice %9 {offsets = [0, 24], sizes = [8, 1], strides = [1, 1]} : vector<8x32xf32> to vector<8x1xf32>
    %257 = vector.extract_strided_slice %13 {offsets = [24, 0], sizes = [1, 8], strides = [1, 1]} : vector<32x8xf32> to vector<1x8xf32>
    %258 = vector.broadcast %256 : vector<8x1xf32> to vector<8x8xf32>
    %259 = vector.broadcast %257 : vector<1x8xf32> to vector<8x8xf32>
    %260 = arith.addf %258, %259 : vector<8x8xf32>
    %261 = math.tanh %260 : vector<8x8xf32>
    %262 = vector.broadcast %255 : f32 to vector<8x8xf32>
    %263 = arith.mulf %262, %261 : vector<8x8xf32>
    %264 = arith.addf %254, %263 : vector<8x8xf32>
    %c25 = arith.constant 25 : index
    %265 = memref.load %arg10[%c25] : memref<32xf32, #tpu.memory_space<smem>>
    %266 = vector.extract_strided_slice %9 {offsets = [0, 25], sizes = [8, 1], strides = [1, 1]} : vector<8x32xf32> to vector<8x1xf32>
    %267 = vector.extract_strided_slice %13 {offsets = [25, 0], sizes = [1, 8], strides = [1, 1]} : vector<32x8xf32> to vector<1x8xf32>
    %268 = vector.broadcast %266 : vector<8x1xf32> to vector<8x8xf32>
    %269 = vector.broadcast %267 : vector<1x8xf32> to vector<8x8xf32>
    %270 = arith.addf %268, %269 : vector<8x8xf32>
    %271 = math.tanh %270 : vector<8x8xf32>
    %272 = vector.broadcast %265 : f32 to vector<8x8xf32>
    %273 = arith.mulf %272, %271 : vector<8x8xf32>
    %274 = arith.addf %264, %273 : vector<8x8xf32>
    %c26 = arith.constant 26 : index
    %275 = memref.load %arg10[%c26] : memref<32xf32, #tpu.memory_space<smem>>
    %276 = vector.extract_strided_slice %9 {offsets = [0, 26], sizes = [8, 1], strides = [1, 1]} : vector<8x32xf32> to vector<8x1xf32>
    %277 = vector.extract_strided_slice %13 {offsets = [26, 0], sizes = [1, 8], strides = [1, 1]} : vector<32x8xf32> to vector<1x8xf32>
    %278 = vector.broadcast %276 : vector<8x1xf32> to vector<8x8xf32>
    %279 = vector.broadcast %277 : vector<1x8xf32> to vector<8x8xf32>
    %280 = arith.addf %278, %279 : vector<8x8xf32>
    %281 = math.tanh %280 : vector<8x8xf32>
    %282 = vector.broadcast %275 : f32 to vector<8x8xf32>
    %283 = arith.mulf %282, %281 : vector<8x8xf32>
    %284 = arith.addf %274, %283 : vector<8x8xf32>
    %c27 = arith.constant 27 : index
    %285 = memref.load %arg10[%c27] : memref<32xf32, #tpu.memory_space<smem>>
    %286 = vector.extract_strided_slice %9 {offsets = [0, 27], sizes = [8, 1], strides = [1, 1]} : vector<8x32xf32> to vector<8x1xf32>
    %287 = vector.extract_strided_slice %13 {offsets = [27, 0], sizes = [1, 8], strides = [1, 1]} : vector<32x8xf32> to vector<1x8xf32>
    %288 = vector.broadcast %286 : vector<8x1xf32> to vector<8x8xf32>
    %289 = vector.broadcast %287 : vector<1x8xf32> to vector<8x8xf32>
    %290 = arith.addf %288, %289 : vector<8x8xf32>
    %291 = math.tanh %290 : vector<8x8xf32>
    %292 = vector.broadcast %285 : f32 to vector<8x8xf32>
    %293 = arith.mulf %292, %291 : vector<8x8xf32>
    %294 = arith.addf %284, %293 : vector<8x8xf32>
    %c28 = arith.constant 28 : index
    %295 = memref.load %arg10[%c28] : memref<32xf32, #tpu.memory_space<smem>>
    %296 = vector.extract_strided_slice %9 {offsets = [0, 28], sizes = [8, 1], strides = [1, 1]} : vector<8x32xf32> to vector<8x1xf32>
    %297 = vector.extract_strided_slice %13 {offsets = [28, 0], sizes = [1, 8], strides = [1, 1]} : vector<32x8xf32> to vector<1x8xf32>
    %298 = vector.broadcast %296 : vector<8x1xf32> to vector<8x8xf32>
    %299 = vector.broadcast %297 : vector<1x8xf32> to vector<8x8xf32>
    %300 = arith.addf %298, %299 : vector<8x8xf32>
    %301 = math.tanh %300 : vector<8x8xf32>
    %302 = vector.broadcast %295 : f32 to vector<8x8xf32>
    %303 = arith.mulf %302, %301 : vector<8x8xf32>
    %304 = arith.addf %294, %303 : vector<8x8xf32>
    %c29 = arith.constant 29 : index
    %305 = memref.load %arg10[%c29] : memref<32xf32, #tpu.memory_space<smem>>
    %306 = vector.extract_strided_slice %9 {offsets = [0, 29], sizes = [8, 1], strides = [1, 1]} : vector<8x32xf32> to vector<8x1xf32>
    %307 = vector.extract_strided_slice %13 {offsets = [29, 0], sizes = [1, 8], strides = [1, 1]} : vector<32x8xf32> to vector<1x8xf32>
    %308 = vector.broadcast %306 : vector<8x1xf32> to vector<8x8xf32>
    %309 = vector.broadcast %307 : vector<1x8xf32> to vector<8x8xf32>
    %310 = arith.addf %308, %309 : vector<8x8xf32>
    %311 = math.tanh %310 : vector<8x8xf32>
    %312 = vector.broadcast %305 : f32 to vector<8x8xf32>
    %313 = arith.mulf %312, %311 : vector<8x8xf32>
    %314 = arith.addf %304, %313 : vector<8x8xf32>
    %c30 = arith.constant 30 : index
    %315 = memref.load %arg10[%c30] : memref<32xf32, #tpu.memory_space<smem>>
    %316 = vector.extract_strided_slice %9 {offsets = [0, 30], sizes = [8, 1], strides = [1, 1]} : vector<8x32xf32> to vector<8x1xf32>
    %317 = vector.extract_strided_slice %13 {offsets = [30, 0], sizes = [1, 8], strides = [1, 1]} : vector<32x8xf32> to vector<1x8xf32>
    %318 = vector.broadcast %316 : vector<8x1xf32> to vector<8x8xf32>
    %319 = vector.broadcast %317 : vector<1x8xf32> to vector<8x8xf32>
    %320 = arith.addf %318, %319 : vector<8x8xf32>
    %321 = math.tanh %320 : vector<8x8xf32>
    %322 = vector.broadcast %315 : f32 to vector<8x8xf32>
    %323 = arith.mulf %322, %321 : vector<8x8xf32>
    %324 = arith.addf %314, %323 : vector<8x8xf32>
    %c31 = arith.constant 31 : index
    %325 = memref.load %arg10[%c31] : memref<32xf32, #tpu.memory_space<smem>>
    %326 = vector.extract_strided_slice %9 {offsets = [0, 31], sizes = [8, 1], strides = [1, 1]} : vector<8x32xf32> to vector<8x1xf32>
    %327 = vector.extract_strided_slice %13 {offsets = [31, 0], sizes = [1, 8], strides = [1, 1]} : vector<32x8xf32> to vector<1x8xf32>
    %328 = vector.broadcast %326 : vector<8x1xf32> to vector<8x8xf32>
    %329 = vector.broadcast %327 : vector<1x8xf32> to vector<8x8xf32>
    %330 = arith.addf %328, %329 : vector<8x8xf32>
    %331 = math.tanh %330 : vector<8x8xf32>
    %332 = vector.broadcast %325 : f32 to vector<8x8xf32>
    %333 = arith.mulf %332, %331 : vector<8x8xf32>
    %334 = arith.addf %324, %333 : vector<8x8xf32>
    %cst_14 = arith.constant dense<0xFF800000> : vector<8xf32>
    %335 = vector.multi_reduction <maximumf>, %334, %cst_14 [1] : vector<8x8xf32> to vector<8xf32>
    %336 = vector.shape_cast %335 : vector<8xf32> to vector<8x1xf32>
    %337 = arith.maximumf %10, %336 : vector<8x1xf32>
    %338 = arith.subf %10, %337 : vector<8x1xf32>
    %339 = math.exp %338 : vector<8x1xf32>
    %340 = vector.broadcast %337 : vector<8x1xf32> to vector<8x8xf32>
    %341 = arith.subf %334, %340 : vector<8x8xf32>
    %342 = math.exp %341 : vector<8x8xf32>
    %343 = arith.mulf %339, %11 : vector<8x1xf32>
    %cst_15 = arith.constant dense<0.000000e+00> : vector<8xf32>
    %344 = vector.multi_reduction <add>, %342, %cst_15 [1] : vector<8x8xf32> to vector<8xf32>
    %345 = vector.shape_cast %344 : vector<8xf32> to vector<8x1xf32>
    %346 = arith.addf %343, %345 : vector<8x1xf32>
    %347 = vector.broadcast %339 : vector<8x1xf32> to vector<8x32xf32>
    %348 = arith.mulf %347, %12 : vector<8x32xf32>
    %c0_16 = arith.constant 0 : index
    %c0_17 = arith.constant 0 : index
    %349 = vector.load %arg13[%c0_16, %c0_17] : memref<8x32xf32, #tpu.memory_space<vmem>>, vector<8x32xf32>
    %cst_18 = arith.constant dense<0.000000e+00> : vector<8x32xf32>
    %350 = tpu.matmul %342, %349, %cst_18 {dimension_numbers = #tpu.dot_dimension_numbers<[1], [0], [0], [1], [0, 0, 1, 1], [], []>} : vector<8x8xf32>, vector<8x32xf32>, vector<8x32xf32> -> vector<8x32xf32>
    %351 = arith.addf %348, %350 : vector<8x32xf32>
    %352 = tpu.reciprocal %346 {approx = true} : vector<8x1xf32> -> vector<8x1xf32>
    %353 = arith.mulf %346, %352 : vector<8x1xf32>
    %cst_19 = arith.constant 2.000000e+00 : f32
    %354 = vector.broadcast %cst_19 : f32 to vector<8x1xf32>
    %355 = arith.subf %354, %353 : vector<8x1xf32>
    %356 = arith.mulf %352, %355 : vector<8x1xf32>
    %357 = vector.broadcast %356 : vector<8x1xf32> to vector<8x32xf32>
    %358 = arith.mulf %351, %357 : vector<8x32xf32>
    %c0_20 = arith.constant 0 : index
    %c0_21 = arith.constant 0 : index
    %c0_22 = arith.constant 0 : index
    %359 = vector.load %arg11[%c0_20, %c0_21, %c0_22] : memref<1x8x32xf32, #tpu.memory_space<vmem>>, vector<1x8x32xf32>
    %360 = vector.shape_cast %359 : vector<1x8x32xf32> to vector<8x32xf32>
    %361 = vector.shape_cast %358 : vector<8x32xf32> to vector<1x8x32xf32>
    tpu.vector_store %arg11[%c0_20, %c0_21, %c0_22], %361 {strides = array<i32>} : memref<1x8x32xf32, #tpu.memory_space<vmem>>, vector<1x8x32xf32>,
    return
  }
  func.func @transform_0(%arg0: i32, %arg1: i32) -> (i32, i32, i32) {
    %c0_i32 = arith.constant 0 : i32
    %c0_i32_0 = arith.constant 0 : i32
    return %arg0, %arg1, %c0_i32 : i32, i32, i32
  }
  func.func @transform_1(%arg0: i32, %arg1: i32) -> (i32, i32, i32) {
    %c0_i32 = arith.constant 0 : i32
    %c0_i32_0 = arith.constant 0 : i32
    %c0_i32_1 = arith.constant 0 : i32
    return %arg0, %c0_i32, %c0_i32_0 : i32, i32, i32
  }
  func.func @transform_2(%arg0: i32, %arg1: i32) -> (i32, i32, i32) {
    %c0_i32 = arith.constant 0 : i32
    %c0_i32_0 = arith.constant 0 : i32
    %c0_i32_1 = arith.constant 0 : i32
    return %arg0, %c0_i32, %c0_i32_0 : i32, i32, i32
  }
  func.func @transform_3(%arg0: i32, %arg1: i32) -> (i32, i32) {
    %c0_i32 = arith.constant 0 : i32
    %c0_i32_0 = arith.constant 0 : i32
    %c0_i32_1 = arith.constant 0 : i32
    return %c0_i32, %c0_i32_0 : i32, i32
  }
  func.func @transform_4(%arg0: i32, %arg1: i32) -> (i32, i32) {
    %c0_i32 = arith.constant 0 : i32
    %c0_i32_0 = arith.constant 0 : i32
    %c0_i32_1 = arith.constant 0 : i32
    return %c0_i32, %c0_i32_0 : i32, i32
  }
  func.func @transform_5(%arg0: i32, %arg1: i32) -> (i32, i32) {
    %c0_i32 = arith.constant 0 : i32
    %c0_i32_0 = arith.constant 0 : i32
    %c0_i32_1 = arith.constant 0 : i32
    return %c0_i32, %c0_i32_0 : i32, i32
  }
  func.func @transform_6(%arg0: i32, %arg1: i32) -> (i32, i32) {
    %c0_i32 = arith.constant 0 : i32
    %c0_i32_0 = arith.constant 0 : i32
    %c0_i32_1 = arith.constant 0 : i32
    return %c0_i32, %c0_i32_0 : i32, i32
  }
  func.func @transform_7(%arg0: i32, %arg1: i32) -> (i32, i32) {
    %c0_i32 = arith.constant 0 : i32
    %c0_i32_0 = arith.constant 0 : i32
    %c0_i32_1 = arith.constant 0 : i32
    return %c0_i32, %c0_i32_0 : i32, i32
  }
  func.func @transform_8(%arg0: i32, %arg1: i32) -> i32 {
    %c0_i32 = arith.constant 0 : i32
    %c0_i32_0 = arith.constant 0 : i32
    return %c0_i32 : i32
  }
  func.func @transform_9(%arg0: i32, %arg1: i32) -> (i32, i32, i32) {
    %c0_i32 = arith.constant 0 : i32
    %c0_i32_0 = arith.constant 0 : i32
    return %arg0, %arg1, %c0_i32 : i32, i32, i32
  }
}

</mosaic_0001>

<bundles_post_ra>
// kernel: tpu_custom_call.1
= control target key start
LH: loop header
LB: loop body
LE: loop exit
PB: predicated region body
PF: predicated region fallthrough
CT: control target
= control target key end

     0   :  { %s2425_s0 = inlined_call_operand.vmem [shape: f32[2,8,32], index: 0, kind: input, shape index: {}]   ;;  %s2426_s1 = inlined_call_operand.vmem [shape: f32[2,32,8], index: 1, kind: input, shape index: {}]   ;;  %s2427_s2 = inlined_call_operand.hbm [shape: f32[2,8,32], index: 2, kind: input, shape index: {}]   ;;  %s2428_s3 = inlined_call_operand.vmem [shape: f32[32,32], index: 3, kind: input, shape index: {}]   ;;  %s2429_s4 = inlined_call_operand.vmem [shape: f32[32,32], index: 4, kind: input, shape index: {}]   ;;  %s2430_s5 = inlined_call_operand.hbm [shape: f32[32,32], index: 5, kind: input, shape index: {}]   ;;  %s2431_s6 = inlined_call_operand.vmem [shape: f32[1,32], index: 6, kind: input, shape index: {}]   ;;  %s2432_s7 = inlined_call_operand.vmem [shape: f32[1,32], index: 7, kind: input, shape index: {}]   ;;  %s2433_s8 = inlined_call_operand.vmem [shape: f32[32], index: 8, kind: input, shape index: {}]   ;;  %s2434_s9 = inlined_call_operand.hbm [shape: f32[2,8,32], index: 9, kind: output, shape index: {}]  }
   0x1   :  { %2441 = sst [smem:[#allocation19_spill]] %s2430_s5 }
   0x2   :  { %2442 = sst [smem:[#allocation20_spill]] %s2433_s8 }
   0x3   :  { %14 = vsyncpa [#allocation5], 0 }
   0x4   :  { %16 = vsyncpa [#allocation5 + $0x1], 0 }
   0x5   :  { %17 = vsyncpa [#allocation9], 0 }
   0x6   :  { %18 = vsyncpa [#allocation7], 0 }
   0x7   :  { %19 = vsyncpa [#allocation6], 0 }
   0x8   :  { %21 = vsyncpa [#allocation6 + $0x1], 0  ;;  %s2011_s30 = smov 0   ;;  %s2013_s10 = smov 0  }
   0x9   :  { %s2015_s11 = smov 0   ;;  %s2017_s12 = smov 0  }
   0xa   :  { %s2019_s13 = smov 0   ;;  %s2021_s14 = smov 0  }
   0xb LB: > { %2443 = sst [smem:[#allocation16_spill]] %s1915_s13  ;;  %s1418_s15 = sadd.s32 4294967295, %s1919_s14   ;;  %s1919_s14 = sphi %s2021_s14, %s27_s14   ;;  %s1915_s13 = sphi %s2019_s13, %s2462_s13   ;;  %s1911_s12 = sphi %s2017_s12, %s2461_s12   ;;  %s1907_s11 = sphi %s2015_s11, %s2465_s11   ;;  %s1903_s10 = sphi %s2013_s10, %s2464_s10   ;;  %s1899_s30 = sphi %s2011_s30, %s2463_s30  }
   0xc   : > { %s1419_s16 = sadd.s32 4294967294, %s1919_s14   ;;  %p113_p0 = scmp.ne.s32.totalorder %s1903_s10, %s1899_s30 }
   0xd   : > { %p2045_p1 = scmp.eq.s32.totalorder %s1418_s15, 0  ;;  %p2049_p2 = scmp.eq.s32.totalorder %s1418_s15, 1 }
   0xe   : > { %p271_p3 = scmp.eq.s32.totalorder %s1419_s16, 1  ;;  %p1420_p5 = scmp.ge.s32.totalorder %s1919_s14, 1 }
   0xf   : > { %s2444_s17 = scalar_select %p2045_p1, 1, 0 }
  0x10   : > { %p2055_p4 = por %p2045_p1, %p113_p0  ;;  %p2060_p6 = por %p271_p3, %p113_p0 }
  0x11   : > { %p278_p7 = scmp.lt.s32.totalorder %s1919_s14, 3  ;;  %s1921_s22 = smov [#allocation8]  }
  0x12   : > { %s2446_s19 = scalar_select %p2055_p4, 1, 0 }
  0x13   : > { %s2447_s20 = scalar_select %p2060_p6, 1, 0 }
  0x14   : > { %p2065_p8 = pnand %p1420_p5, %p278_p7  ;;  %s296_s23 = sshll.u32 %s1921_s22, 4  ;;  %s297_s23 = int_to_ptr.vmem [resolvable:$true] %s296_s23 }
  0x15   : > { %2448 = sst [smem:[#allocation17_spill]] %s2447_s20  ;;  %s1773_s28 = scalar_lea.vmem %s297_s23, 512 }
  0x16   : > { %p1552_p9 = pneg %p2065_p8  ;;  %s2450_s8 = sld [smem:[#allocation20_spill]] }
  0x17   : > { %p1774_p13 = scmp.ne.s32.totalorder %s297_s23, %s1773_s28  ;;  %p1781_p5 = scmp.lt.s32.totalorder %s297_s23, %s297_s23 }
  0x18   : > { %p2077_p11 = pnand %p1552_p9, %p2045_p1  ;;  %p1782_p7 = scmp.lt.s32.totalorder %s1773_s28, %s1773_s28 }
  0x1a   : > { %p1764_p12 = pneg %p2077_p11  ;;  %p1783_p10 = por %p1782_p7, %p1781_p5 }
  0x1c   : > { %s316_s26 = sshll.u32 %s2450_s8, 4  ;;  %p1776_p0 = pnand %p1774_p13, %p1764_p12  ;;  %s317_s26 = int_to_ptr.vmem [resolvable:$true] %s316_s26 }
  0x1e   : > { %p1777_p3 = pneg %p1776_p0 }
  0x20   : > { %p1784_p6 = pnand %p1783_p10, %p1777_p3 }
  0x22   : > { %1787 = shalt.err (!%p1784_p6)
}
  0x23   : > { %s1922_s29 = smov 128   ;;  %s1923_s15 = smov 8  }
  0x24   : > { %s2452_s5 = sld [smem:[#allocation19_spill]]  ;;  %s1788_s24 = scalar_lea.vmem %s317_s26, 16 }
  0x25   : > { %p1789_p9 = scmp.ne.s32.totalorder %s317_s26, %s1788_s24  ;;  %p1796_p1 = scmp.lt.s32.totalorder %s317_s26, %s317_s26 }
  0x26   : > { %p1797_p4 = scmp.lt.s32.totalorder %s1788_s24, %s1788_s24 }
  0x27   : > { %p1791_p13 = pnand %p1789_p9, %p1764_p12 }
  0x28   : > { %p1798_p5 = por %p1797_p4, %p1796_p1 }
  0x29   : > { %p1792_p0 = pneg %p1791_p13 }
  0x2a   : > { %1555 = dma.hbm_to_vmem [thread:$0]  (!%p2077_p11), %s2452_s5, 512, %s297_s23, [#allocation9], %s1922_s29, %s1922_s29, %s1923_s15  }
  0x2b   : > { %p1799_p10 = pnand %p1798_p5, %p1792_p0 }
  0x2d   : > { %1802 = shalt.err (!%p1799_p10)
}
  0x2e   : > { %s1924_s25 = smov [#allocation10]   ;;  %s39_s23 = sadd.s32 1, %s1915_s13 }
  0x2f   : > { %1558 = dma.vmem_to_smem (!%p2077_p11), %s317_s26, 16, %s1924_s25, [#allocation7]  }
  0x30   : > { %s100_s28 = sadd.s32 1, %s1907_s11  ;;  %p41_p1 = scmp.ge.s32.totalorder %s39_s23, 2 }
  0x31   : > { %p107_p4 = scmp.ne.s32.totalorder %s1907_s11, %s1903_s10  ;;  %p108_p6 = scmp.eq.s32.totalorder %s1919_s14, 0 }
  0x32   : > { %p1569_p12 = scmp.lt.s32.totalorder %s1919_s14, 2  ;;  %s2467_s23 = smov (%p41_p1, %s39_s23), 0 }
  0x33   : > { %2453 = sst [smem:[#allocation18_spill]] %s2467_s23  ;;  %p109_p3 = por %p108_p6, %p107_p4 }
  0x34   : > { %p2106_p7 = por %p2049_p2, %p107_p4  ;;  %s97_s29 = ssub.s32 %s1915_s13, %s2467_s23 }
  0x35   : > { %s345_s15 = sand.u32 1, %s1907_s11   ;;  %p98_p9 = scmp.eq.s32.totalorder %s97_s29, 0 }
  0x36   : > { %s1424_s26 = sshll.u32 %s345_s15, 3  ;;  %s1425_s16 = sshll.u32 %s1915_s13, 7 }
  0x37   : > { %s2115_s22 = scalar_select %p98_p9, %s1907_s11, %s100_s28  }
  0x38   : > { %s354_s5 = scalar_lea.hbm %s2427_s2, %s1425_s16  ;;  %s349_s8 = scalar_lea.vmem [#allocation4], %s1424_s26 }
  0x39   : > { %s356_s20 = sshll.u32 %s349_s8, 4  ;;  %p2122_p11 = pnand %p1569_p12, %p109_p3  ;;  %s357_s20 = int_to_ptr.vmem [resolvable:$true] %s356_s20 }
  0x3a   : > { %s346_s23 = scalar_lea.sflag [#allocation5], %s345_s15  ;;  %s1816_s29 = scalar_lea.vmem %s357_s20, 128 }
  0x3b   : > { %p1805_p2 = pneg %p2122_p11  ;;  %p1817_p13 = scmp.ne.s32.totalorder %s357_s20, %s1816_s29 }
  0x3c   : > { %s1925_s28 = smov [#allocation4]  }
  0x3d   : > { %p1819_p0 = pnand %p1817_p13, %p1805_p2  ;;  %s1821_s13 = sshll.u32 %s1925_s28, 4  ;;  %s1822_s13 = int_to_ptr.vmem [resolvable:$false] %s1821_s13 }
  0x3e   : > { %s1823_s16 = scalar_lea.vmem %s1822_s13, 256  ;;  %p1824_p10 = scmp.lt.s32.totalorder %s357_s20, %s1822_s13 }
  0x3f   : > { %p1820_p5 = pneg %p1819_p0  ;;  %p1825_p1 = scmp.lt.s32.totalorder %s1823_s16, %s1816_s29 }
  0x41   : > { %p1826_p4 = por %p1825_p1, %p1824_p10 }
  0x43   : > { %p1827_p6 = pnand %p1826_p4, %p1820_p5 }
  0x45   : > { %1830 = shalt.err (!%p1827_p6)
}
  0x46   : > { %1562 = dma.hbm_to_vmem [thread:$0]  (!%p2122_p11), %s354_s5, 128, %s357_s20, %s346_s23  }
  0x47   : > { %365 = sbr.rel (%p2065_p8) target bundleno = 913 (0x391), region = 56  ;;  %s2133_s8 = sand.u32 (!%p2065_p8), 1, %s1903_s10  }
  0x48   : > { %s1427_s15 = sshll.u32 (!%p2065_p8), %s2133_s8, 3  ;;  %s368_s26 = scalar_lea.sflag (!%p2065_p8), [#allocation5], %s2133_s8 }
  0x49   : > { %s2139_s13 = scalar_lea.vmem (!%p2065_p8), [#allocation4], %s1427_s15  ;;  %p2456_p12 = scmp.ne.s32.totalorder (!%p2065_p8), %s2446_s19, 0 }
  0x4c   : > { %1882 = dma.done.wait (%p2456_p12), %s368_s26, 128  }
  0x4d   : > { %1884 = vsyncadd (%p2456_p12), %s368_s26, 4294967168  ;;  %p2457_p3 = scmp.ne.s32.totalorder %s2444_s17, 0 }
  0x4f   : > { %1886 = dma.done.wait (%p2457_p3), [#allocation9], 512  }
  0x50   : > { %1888 = vsyncadd (%p2457_p3), [#allocation9], 4294966784 }
  0x51   : > { %1890 = dma.done.wait (%p2457_p3), [#allocation7], 16  }
  0x52   : > { %1892 = vsyncadd (%p2457_p3), [#allocation7], 4294967280 }
  0x53   : > { %384 = sfence }
  0x54   : > { %p427_p8 = scmp.lt.s32.totalorder %s1911_s12, 1  ;;  %v443_v0 = vld [vmem:[%s2429_s4] sm:$0xff]  ;;  %vm451_vm0 = vcmask 261120   ;;  %v1926_v1 = vmov 0.0   ;;  %vm1927_vm1 = vmmov 0   ;;  %v444_v6 = vld [vmem:[%s2429_s4 + $0x8] sm:$0xff]  ;;  %v736_v59 = vlaneseq }
  0x55   : > { %1507 = vmatprep.mubr.msk.f32.mxu0 %vm451_vm0, %v443_v0  ;;  %1513 = vmatprep.subr.mxu1 %v1926_v1  ;;  %v644_v7 = vld [vmem:[%s2428_s3 + $0x18] sm:$0xff]  ;;  %v445_v8 = vld [vmem:[%s2429_s4 + $0x10] sm:$0xff]  ;;  %v642_v11 = vld [vmem:[%s2428_s3 + $0x8] sm:$0xff]  ;;  %v1928_v14 = vmov 2   ;;  %v1929_v15 = vmov 0   ;;  %vm549_vm2 = vcmask 64512  }
  0x56   : > { %s2160_s19 = scalar_select %p427_p8, %s1911_s12, 1  ;;  %1521 = vmatprep.mubr.msk.f32.mxu1 %vm1927_vm1, %v1926_v1  ;;  %v643_v9 = vld [vmem:[%s2428_s3 + $0x10] sm:$0xff]  ;;  %v446_v10 = vld [vmem:[%s2429_s4 + $0x18] sm:$0xff]  ;;  %v641_v12 = vld [vmem:[%s2428_s3] sm:$0xff]  ;;  %1661 = vset.pattern.permute.xlu1 %v1928_v14  ;;  %v1930_v24 = vmov 3   ;;  %v1931_v25 = vmov 1  }
  0x57   : > { %1659 = vset.pattern.permute.xlu0 %v1929_v15  ;;  %v1440_v20 = vld [vmem:[%s2431_s6] ss:$0 sm:$0xff]  ;;  %v1932_v26 = vmov 4   ;;  %v1933_v27 = vmov 5   ;;  %v1934_v28 = vmov 6   ;;  %v1935_v29 = vmov 8  }
  0x58   : > { %s1478_s17 = sshll.u32 %s2160_s19, 5  ;;  %s1431_s5 = sshll.u32 %s2160_s19, 3  ;;  %v1936_v30 = vmov 7   ;;  %v1937_v31 = vmov 11   ;;  %v1938_v32 = vmov 9   ;;  %v1939_v33 = vmov 14  }
  0x59   : > { %s438_s24 = scalar_lea.vmem %s2426_s1, %s1478_s17  ;;  %s433_s29 = scalar_lea.vmem %s2425_s0, %s1431_s5  ;;  %v1940_v34 = vmov 10   ;;  %v1941_v35 = vmov 17   ;;  %v1942_v36 = vmov 12   ;;  %v1943_v37 = vmov 20   ;;  %v558_v47 = vld [vmem:[#allocation8 + $0x18] sm:$0xff]  ;;  %v557_v49 = vld [vmem:[#allocation8 + $0x10] sm:$0xff] }
  0x5a   : > { %v450_v2 = vld [vmem:[%s438_s24 + $0x18] sm:$0xff]  ;;  %v449_v3 = vld [vmem:[%s438_s24 + $0x10] sm:$0xff]  ;;  %v448_v4 = vld [vmem:[%s438_s24 + $0x8] sm:$0xff]  ;;  %v1944_v38 = vmov 13   ;;  %v1945_v39 = vmov 23   ;;  %v1946_v40 = vmov 15   ;;  %1514 = vmatpush3.msra.mxu1 %v558_v47 }
  0x5b   : > { %1499 = vmatprep.subr.mxu0 %v450_v2  ;;  %v447_v5 = vld [vmem:[%s438_s24] sm:$0xff]  ;;  %v1947_v41 = vmov 26   ;;  %v1948_v42 = vmov 16   ;;  %v1949_v43 = vmov 29   ;;  %v1950_v44 = vmov 18   ;;  %1515 = vmatprep.subr.mxu1 %v1926_v1  ;;  %v555_v52 = vld [vmem:[#allocation8] sm:$0xff] }
  0x5c   : > { %1500 = vmatpush3.msra.mxu0 %v450_v2  ;;  %v640_v13 = vld [vmem:[%s433_s29] sm:$0xff]  ;;  %v1951_v45 = vmov 31   ;;  %v1952_v46 = vmov 19   ;;  %v1953_v48 = vmov 21   ;;  %1516 = vmatpush3.msra.mxu1 %v557_v49  ;;  %v1954_v51 = vmov 22   ;;  %v554_v53 = vld [vmem:[%s2139_s13] sm:$0xff] }
  0x5d   : > { %1501 = vmatprep.subr.mxu0 %v449_v3  ;;  %1517 = vmatprep.subr.mxu1 %v1926_v1  ;;  %v556_v50 = vld [vmem:[#allocation8 + $0x8] sm:$0xff]  ;;  %v1955_v54 = vmov 24   ;;  %v1956_v55 = vmov 25   ;;  %v1957_v56 = vmov 27   ;;  %v1958_v57 = vmov 28   ;;  %s2270_s13 = sld [smem:[#allocation10]] }
  0x5e   : > { %1502 = vmatpush3.msra.mxu0 %v449_v3  ;;  %1518 = vmatpush3.msra.mxu1 %v556_v50  ;;  %v1959_v58 = vmov 30   ;;  %v737_v60 = vshrl.u32 %v736_v59, 7  ;;  %s1442_s20 = sld [smem:[#allocation10 + $0x1]] }
  0x5f   : > { %1503 = vmatprep.subr.mxu0 %v448_v4  ;;  %1519 = vmatprep.subr.mxu1 %v1926_v1  ;;  %s2274_s17 = sld [smem:[#allocation10 + $0x2]] }
  0x60   : > { %1504 = vmatpush3.msra.mxu0 %v448_v4  ;;  %1520 = vmatpush3.msra.mxu1 %v555_v52  ;;  %v2252_v62 = vsub.s32 0, %v737_v60  ;;  %v2254_v63 = vsub.s32 2, %v737_v60  ;;  %v2258_v4 = vsub.s32 1, %v737_v60  ;;  %v2264_v14 = vsub.s32 4, %v737_v60  ;;  %s2277_s21 = sld [smem:[#allocation10 + $0x3]] }
  0x61   : > { %1505 = vmatprep.subr.mxu0 %v447_v5  ;;  %1522 = vmatmul.mubr.msk.f32.vlgmr.msra.gmra.mxu1 %vm451_vm0, %v554_v53  ;;  %v2266_v15 = vsub.s32 5, %v737_v60  ;;  %s2279_s23 = sld [smem:[#allocation10 + $0x4]] }
  0x62   : > { %1506 = vmatpush3.msra.mxu0 %v447_v5  ;;  %1535 = vmatprep.subr.mxu1 %v1926_v1  ;;  %s2289_s24 = sld [smem:[#allocation10 + $0x5]] }
  0x63   : > { %1508 = vmatmul.mubr.msk.f32.vlgmr.msra.gmra.mxu0 %vm451_vm0, %v444_v6  ;;  %1524 = vmatprep.subr.mxu0 %v1926_v1  ;;  %v2260_v6 = vsub.s32 3, %v737_v60  ;;  %s2292_s19 = sld [smem:[#allocation10 + $0x6]] }
  0x64   : > { %1525 = vmatpush3.msra.mxu0 %v644_v7  ;;  %1510 = vmatprep.mubr.msk.f32.mxu0 %vm451_vm0, %v445_v8  ;;  %s2298_s25 = sld [smem:[#allocation10 + $0x7]] }
  0x65   : > { %1526 = vmatprep.subr.mxu0 %v1926_v1  ;;  %1537 = vmatprep.mubr.msk.f32.mxu1 %vm1927_vm1, %v1926_v1  ;;  %s2306_s18 = sld [smem:[#allocation10 + $0x8]] }
  0x66   : > { %1527 = vmatpush3.msra.mxu0 %v643_v9  ;;  %s1450_s29 = sld [smem:[#allocation10 + $0x9]] }
  0x67   : > { %1511 = vmatmul.mubr.msk.f32.gmra.mxu0 %vm451_vm0, %v446_v10  ;;  %1528 = vmatprep.subr.mxu0 %v1926_v1  ;;  %s2311_s28 = sld [smem:[#allocation10 + $0xa]] }
  0x68   : > { %1529 = vmatpush3.msra.mxu0 %v642_v11  ;;  %1532 = vmatprep.mubr.msk.f32.mxu0 %vm1927_vm1, %v1926_v1  ;;  %s2318_s16 = sld [smem:[#allocation10 + $0xb]] }
  0x69   : > { %1530 = vmatprep.subr.mxu0 %v1926_v1  ;;  %s1453_s26 = sld [smem:[#allocation10 + $0xc]] }
  0x6a   : > { %1531 = vmatpush3.msra.mxu0 %v641_v12  ;;  %s1454_s5 = sld [smem:[#allocation10 + $0xd]] }
  0x6b   : > { %1533 = vmatmul.mubr.msk.f32.vlgmr.msra.gmra.mxu0 %vm451_vm0, %v640_v13 }
 0x123   : > { %v1509_v16 = vpop.f32.mrf.mxu0 }
 0x124   : > { %551 = vst.msk [vmem:[#allocation2 + $0x8] sm:$0xff] %vm549_vm2, %v1509_v16 }
 0x125   : > { %v530_v17 = vpop.f32.mrf.mxu0 }
 0x126   : > { %550 = vst.msk [vmem:[#allocation2] sm:$0xff] %vm549_vm2, %v530_v17 }
 0x127   : > { %v1512_v18 = vpop.f32.mrf.mxu0 }
 0x128   : > { %553 = vst.msk [vmem:[#allocation2 + $0x18] sm:$0xff] %vm549_vm2, %v1512_v18 }
 0x129   : > { %v540_v19 = vpop.f32.mrf.mxu0 }
 0x12a   : > { %552 = vst.msk [vmem:[#allocation2 + $0x10] sm:$0xff] %vm549_vm2, %v540_v19 }
 0x12b   : > { %v722_v21 = vpop.f32.mrf.mxu0 }
 0x12c   : > { %v2210_v22 = vadd.f32 %v1440_v20, %v722_v21 }
 0x12d   : > { %v1534_v23 = vpop.f32.mrf.mxu0  ;;  %v726_v61 = vld [vmem:[#allocation2] sm:$0xff] }
 0x12e   : > { %761 = vperm.xlu1 %1661, %v2210_v22   ;;  %733 = vperm.xlu0 %1659, %v2210_v22   ;;  %v739_v2 = vrot.slane %v726_v61, %v2252_v62  ;;  %v767_v3 = vrot.slane %v726_v61, %v2254_v63  ;;  %v753_v8 = vrot.slane %v726_v61, %v2258_v4 }
 0x12f   : > { %v781_v9 = vrot.slane %v726_v61, %v2260_v6  ;;  %v795_v16 = vrot.slane %v726_v61, %v2264_v14  ;;  %v809_v17 = vrot.slane %v726_v61, %v2266_v15 }
 0x132   : > { %1662 = vset.pattern.permute.xlu1 %v1930_v24  ;;  %1660 = vset.pattern.permute.xlu0 %v1931_v25 }
 0x133   : > { %775 = vperm.xlu1 %1662, %v2210_v22   ;;  %747 = vperm.xlu0 %1660, %v2210_v22  }
 0x137   : > { %1663 = vset.pattern.permute.xlu1 %v1932_v26  ;;  %1664 = vset.pattern.permute.xlu0 %v1933_v27  ;;  %v2281_v26 = vld [vmem:[#allocation2 + $0x8] sm:$0xff]  ;;  %v2283_v27 = vsub.s32 7, %v737_v60 }
 0x138   : > { %789 = vperm.xlu1 %1663, %v2210_v22   ;;  %803 = vperm.xlu0 %1664, %v2210_v22   ;;  %v879_v59 = vrot.slane %v2281_v26, %v2254_v63 }
 0x13c   : > { %1665 = vset.pattern.permute.xlu1 %v1934_v28  ;;  %1667 = vset.pattern.permute.xlu0 %v1935_v29  ;;  %v851_v29 = vrot.slane %v2281_v26, %v2252_v62 }
 0x13d   : > { %817 = vperm.xlu1 %1665, %v2210_v22   ;;  %845 = vperm.xlu0 %1667, %v2210_v22  }
 0x141   : > { %1666 = vset.pattern.permute.xlu1 %v1936_v30  ;;  %1670 = vset.pattern.permute.xlu0 %v1937_v31  ;;  %v837_v30 = vrot.slane %v726_v61, %v2283_v27 }
 0x142   : > { %831 = vperm.xlu1 %1666, %v2210_v22   ;;  %887 = vperm.xlu0 %1670, %v2210_v22  }
 0x146   : > { %1668 = vset.pattern.permute.xlu1 %v1938_v32  ;;  %1673 = vset.pattern.permute.xlu0 %v1939_v33  ;;  %v742_v32 = vstv %s2270_s13  ;;  %v756_v33 = vstv %s1442_s20  ;;  %s2330_s13 = sld [smem:[#allocation10 + $0xe]] }
 0x147   : > { %859 = vperm.xlu1 %1668, %v2210_v22   ;;  %929 = vperm.xlu0 %1673, %v2210_v22   ;;  %s1456_s20 = sld [smem:[#allocation10 + $0xf]] }
 0x14b   : > { %1669 = vset.pattern.permute.xlu1 %v1940_v34  ;;  %1676 = vset.pattern.permute.xlu0 %v1941_v35 }
 0x14c   : > { %873 = vperm.xlu1 %1669, %v2210_v22   ;;  %971 = vperm.xlu0 %1676, %v2210_v22  }
 0x150   : > { %1671 = vset.pattern.permute.xlu1 %v1942_v36  ;;  %1679 = vset.pattern.permute.xlu0 %v1943_v37 }
 0x151   : > { %901 = vperm.xlu1 %1671, %v2210_v22   ;;  %1013 = vperm.xlu0 %1679, %v2210_v22  }
 0x155   : > { %1672 = vset.pattern.permute.xlu1 %v1944_v38  ;;  %1682 = vset.pattern.permute.xlu0 %v1945_v39  ;;  %v770_v39 = vstv %s2274_s17  ;;  %s1457_s17 = sld [smem:[#allocation10 + $0x10]] }
 0x156   : > { %915 = vperm.xlu1 %1672, %v2210_v22   ;;  %1055 = vperm.xlu0 %1682, %v2210_v22  }
 0x15a   : > { %1674 = vset.pattern.permute.xlu1 %v1946_v40  ;;  %1685 = vset.pattern.permute.xlu0 %v1947_v41 }
 0x15b   : > { %943 = vperm.xlu1 %1674, %v2210_v22   ;;  %1097 = vperm.xlu0 %1685, %v2210_v22  }
 0x15f   : > { %1675 = vset.pattern.permute.xlu1 %v1948_v42  ;;  %1688 = vset.pattern.permute.xlu0 %v1949_v43  ;;  %v784_v43 = vstv %s2277_s21  ;;  %s2339_s21 = sld [smem:[#allocation10 + $0x11]] }
 0x160   : > { %957 = vperm.xlu1 %1675, %v2210_v22   ;;  %1139 = vperm.xlu0 %1688, %v2210_v22  }
 0x164   : > { %1677 = vset.pattern.permute.xlu1 %v1950_v44  ;;  %1691 = vset.pattern.permute.xlu0 %v1951_v45  ;;  %v798_v44 = vstv %s2279_s23  ;;  %s1459_s23 = sld [smem:[#allocation10 + $0x12]] }
 0x165   : > { %985 = vperm.xlu1 %1677, %v2210_v22  }
 0x169   : > { %1678 = vset.pattern.permute.xlu1 %v1952_v46 }
 0x16a   : > { %999 = vperm.xlu1 %1678, %v2210_v22  }
 0x16e   : > { %1680 = vset.pattern.permute.xlu1 %v1953_v48 }
 0x16f   : > { %1027 = vperm.xlu1 %1680, %v2210_v22  }
 0x173   : > { %1681 = vset.pattern.permute.xlu1 %v1954_v51 }
 0x174   : > { %1041 = vperm.xlu1 %1681, %v2210_v22  }
 0x178   : > { %1683 = vset.pattern.permute.xlu1 %v1955_v54 }
 0x179   : > { %1069 = vperm.xlu1 %1683, %v2210_v22  }
 0x17d   : > { %1684 = vset.pattern.permute.xlu1 %v1956_v55  ;;  %v812_v55 = vstv %s2289_s24  ;;  %s2343_s24 = sld [smem:[#allocation10 + $0x13]] }
 0x17e   : > { %1083 = vperm.xlu1 %1684, %v2210_v22  }
 0x182   : > { %1686 = vset.pattern.permute.xlu1 %v1957_v56 }
 0x183   : > { %1111 = vperm.xlu1 %1686, %v2210_v22  }
 0x187   : > { %1687 = vset.pattern.permute.xlu1 %v1958_v57 }
 0x188   : > { %1125 = vperm.xlu1 %1687, %v2210_v22  }
 0x18c   : > { %1689 = vset.pattern.permute.xlu1 %v1959_v58  ;;  %v893_v58 = vrot.slane %v2281_v26, %v2260_v6 }
 0x18d   : > { %1153 = vperm.xlu1 %1689, %v2210_v22  }
 0x191   : > { %1690 = vset.pattern.permute.xlu1 %v1951_v45  ;;  %v865_v45 = vrot.slane %v2281_v26, %v2258_v4 }
 0x192   : > { %1167 = vperm.xlu1 %1690, %v2210_v22   ;;  %v2272_v22 = vsub.s32 6, %v737_v60  ;;  %v826_v60 = vstv %s2292_s19  ;;  %s2350_s19 = sld [smem:[#allocation10 + $0x14]] }
 0x194   : > { %v823_v23 = vrot.slane %v726_v61, %v2272_v22 }
 0x1a9   : > { %v762_v0 = vpop.permute.xlu1 %761  ;;  %v734_v1 = vpop.permute.xlu0 %733 }
 0x1aa   : > { %v740_v5 = vadd.f32 %v739_v2, %v734_v1  ;;  %v768_v7 = vadd.f32 %v767_v3, %v762_v0 }
 0x1ac   : > { %1692 = vtanh.f32 %v740_v5 }
 0x1ad   : > { %1694 = vtanh.f32 %v768_v7 }
 0x1ae   : > { %v776_v10 = vpop.permute.xlu1 %775  ;;  %v748_v11 = vpop.permute.xlu0 %747 }
 0x1af   : > { %v754_v12 = vadd.f32 %v753_v8, %v748_v11  ;;  %v782_v13 = vadd.f32 %v781_v9, %v776_v10  ;;  %v840_v9 = vstv %s2298_s25  ;;  %v907_v10 = vrot.slane %v2281_v26, %v2264_v14  ;;  %s1462_s25 = sld [smem:[#allocation10 + $0x15]] }
 0x1b1   : > { %1696 = vtanh.f32 %v754_v12 }
 0x1b2   : > { %1698 = vtanh.f32 %v782_v13 }
 0x1b3   : > { %v790_v18 = vpop.permute.xlu1 %789  ;;  %v804_v19 = vpop.permute.xlu0 %803 }
 0x1b4   : > { %v796_v20 = vadd.f32 %v795_v16, %v790_v18  ;;  %v810_v21 = vadd.f32 %v809_v17, %v804_v19  ;;  %v854_v19 = vstv %s2306_s18  ;;  %s1463_s18 = sld [smem:[#allocation10 + $0x16]] }
 0x1b6   : > { %1700 = vtanh.f32 %v796_v20 }
 0x1b7   : > { %1702 = vtanh.f32 %v810_v21 }
 0x1b8   : > { %v818_v24 = vpop.permute.xlu1 %817  ;;  %v846_v28 = vpop.permute.xlu0 %845 }
 0x1b9   : > { %v824_v25 = vadd.f32 %v823_v23, %v818_v24  ;;  %v1693_v31 = vpop.eup %1692  ;;  %v852_v36 = vadd.f32 %v851_v29, %v846_v28  ;;  %v935_v23 = vrot.slane %v2281_v26, %v2272_v22  ;;  %v921_v24 = vrot.slane %v2281_v26, %v2266_v15 }
 0x1ba   : > { %v1695_v35 = vpop.eup %1694  ;;  %v743_v40 = vmul.f32 %v1693_v31, %v742_v32 }
 0x1bb   : > { %1704 = vtanh.f32 %v824_v25  ;;  %v771_v46 = vmul.f32 %v1695_v35, %v770_v39  ;;  %v868_v25 = vstv %s1450_s29  ;;  %v882_v35 = vstv %s2311_s28  ;;  %v2323_v39 = vld [vmem:[#allocation2 + $0x10] sm:$0xff]  ;;  %s2362_s29 = sld [smem:[#allocation10 + $0x17]] }
 0x1bc   : > { %s1465_s28 = sld [smem:[#allocation10 + $0x18]] }
 0x1bd   : > { %v832_v34 = vpop.permute.xlu1 %831  ;;  %v888_v56 = vpop.permute.xlu0 %887 }
 0x1be   : > { %v838_v37 = vadd.f32 %v837_v30, %v832_v34  ;;  %v1697_v38 = vpop.eup %1696  ;;  %v894_v3 = vadd.f32 %v893_v58, %v888_v56  ;;  %v924_v56 = vstv %s1454_s5  ;;  %s1468_s5 = sld [smem:[#allocation10 + $0x1b]] }
 0x1bf   : > { %v757_v41 = vmul.f32 %v1697_v38, %v756_v33  ;;  %v1699_v42 = vpop.eup %1698 }
 0x1c0   : > { %1706 = vtanh.f32 %v838_v37  ;;  %v785_v51 = vmul.f32 %v1699_v42, %v784_v43 }
 0x1c1   : > { %v758_v47 = vadd.f32 %v757_v41, %v743_v40  ;;  %1708 = vtanh.f32 %v852_v36  ;;  %v949_v36 = vrot.slane %v2281_v26, %v2283_v27  ;;  %v963_v26 = vrot.slane %v2323_v39, %v2252_v62 }
 0x1c2   : > { %v860_v48 = vpop.permute.xlu1 %859  ;;  %v930_v20 = vpop.permute.xlu0 %929 }
 0x1c3   : > { %v1701_v49 = vpop.eup %1700  ;;  %v866_v50 = vadd.f32 %v865_v45, %v860_v48  ;;  %v772_v52 = vadd.f32 %v771_v46, %v758_v47  ;;  %v936_v31 = vadd.f32 %v935_v23, %v930_v20  ;;  %v977_v47 = vrot.slane %v2323_v39, %v2258_v4 }
 0x1c4   : > { %v799_v53 = vmul.f32 %v1701_v49, %v798_v44  ;;  %v1703_v54 = vpop.eup %1702  ;;  %v896_v44 = vstv %s2318_s16  ;;  %v910_v48 = vstv %s1453_s26  ;;  %v1033_v20 = vrot.slane %v2323_v39, %v2266_v15  ;;  %s1466_s16 = sld [smem:[#allocation10 + $0x19]] }
 0x1c5   : > { %1710 = vtanh.f32 %v866_v50  ;;  %v786_v57 = vadd.f32 %v785_v51, %v772_v52  ;;  %v813_v2 = vmul.f32 %v1703_v54, %v812_v55  ;;  %s1467_s26 = sld [smem:[#allocation10 + $0x1a]] }
 0x1c7   : > { %v874_v61 = vpop.permute.xlu1 %873  ;;  %v800_v1 = vadd.f32 %v799_v53, %v786_v57  ;;  %v972_v45 = vpop.permute.xlu0 %971  ;;  %v991_v57 = vrot.slane %v2323_v39, %v2254_v63 }
 0x1c8   : > { %v1705_v0 = vpop.eup %1704  ;;  %v880_v5 = vadd.f32 %v879_v59, %v874_v61  ;;  %v978_v52 = vadd.f32 %v977_v47, %v972_v45  ;;  %v1008_v45 = vstv %s2343_s24 }
 0x1c9   : > { %v814_v7 = vadd.f32 %v813_v2, %v800_v1  ;;  %v827_v8 = vmul.f32 %v1705_v0, %v826_v60  ;;  %v938_v2 = vstv %s2330_s13  ;;  %s1469_s13 = sld [smem:[#allocation10 + $0x1c]] }
 0x1ca   : > { %1712 = vtanh.f32 %v880_v5  ;;  %v1019_v5 = vrot.slane %v2323_v39, %v2264_v14 }
 0x1cb   : > { %1714 = vtanh.f32 %v894_v3  ;;  %v828_v16 = vadd.f32 %v827_v8, %v814_v7  ;;  %v1005_v8 = vrot.slane %v2323_v39, %v2260_v6 }
 0x1cc   : > { %v902_v11 = vpop.permute.xlu1 %901  ;;  %v1014_v3 = vpop.permute.xlu0 %1013 }
 0x1cd   : > { %v1707_v12 = vpop.eup %1706  ;;  %v908_v13 = vadd.f32 %v907_v10, %v902_v11 }
 0x1ce   : > { %v841_v17 = vmul.f32 %v1707_v12, %v840_v9  ;;  %v1709_v18 = vpop.eup %1708  ;;  %v952_v9 = vstv %s1456_s20  ;;  %s1470_s20 = sld [smem:[#allocation10 + $0x1d]] }
 0x1cf   : > { %1716 = vtanh.f32 %v908_v13  ;;  %v855_v30 = vmul.f32 %v1709_v18, %v854_v19  ;;  %v1020_v13 = vadd.f32 %v1019_v5, %v1014_v3  ;;  %v966_v19 = vstv %s1457_s17  ;;  %s1471_s17 = sld [smem:[#allocation10 + $0x1e]] }
 0x1d0   : > { %v842_v21 = vadd.f32 %v841_v17, %v828_v16 }
 0x1d1   : > { %v916_v28 = vpop.permute.xlu1 %915 }
 0x1d2   : > { %v1711_v29 = vpop.eup %1710  ;;  %v922_v32 = vadd.f32 %v921_v24, %v916_v28  ;;  %v856_v33 = vadd.f32 %v855_v30, %v842_v21  ;;  %v980_v30 = vstv %s2339_s21  ;;  %s1472_s21 = sld [smem:[#allocation10 + $0x1f]] }
 0x1d3   : > { %v869_v34 = vmul.f32 %v1711_v29, %v868_v25 }
 0x1d4   : > { %1718 = vtanh.f32 %v922_v32  ;;  %v1061_v32 = vrot.slane %v2323_v39, %v2283_v27 }
 0x1d5   : > { %1720 = vtanh.f32 %v936_v31  ;;  %v870_v41 = vadd.f32 %v869_v34, %v856_v33  ;;  %v1056_v31 = vpop.permute.xlu0 %1055  ;;  %v1047_v34 = vrot.slane %v2323_v39, %v2272_v22 }
 0x1d6   : > { %v944_v37 = vpop.permute.xlu1 %943 }
 0x1d7   : > { %v1713_v38 = vpop.eup %1712  ;;  %v950_v40 = vadd.f32 %v949_v36, %v944_v37 }
 0x1d8   : > { %v883_v42 = vmul.f32 %v1713_v38, %v882_v35  ;;  %v1715_v43 = vpop.eup %1714  ;;  %v994_v35 = vstv %s1459_s23 }
 0x1d9   : > { %1722 = vtanh.f32 %v950_v40  ;;  %v897_v51 = vmul.f32 %v1715_v43, %v896_v44  ;;  %v1062_v40 = vadd.f32 %v1061_v32, %v1056_v31  ;;  %v1106_v32 = vstv %s1467_s26  ;;  %s1276_s26 = scalar_lea.sflag [#allocation6], %s2133_s8 }
 0x1da   : > { %v884_v46 = vadd.f32 %v883_v42, %v870_v41  ;;  %v2352_v41 = vld [vmem:[#allocation2 + $0x18] sm:$0xff] }
 0x1db   : > { %v958_v49 = vpop.permute.xlu1 %957 }
 0x1dc   : > { %v1717_v50 = vpop.eup %1716  ;;  %v964_v53 = vadd.f32 %v963_v26, %v958_v49  ;;  %v898_v54 = vadd.f32 %v897_v51, %v884_v46  ;;  %v1075_v46 = vrot.slane %v2352_v41, %v2252_v62  ;;  %v1022_v51 = vstv %s2350_s19  ;;  %s1475_s19 = sshll.u32 %s1911_s12, 7  ;;  %s1960_s12 = smov [#allocation11]  }
 0x1dd   : > { %v911_v55 = vmul.f32 %v1717_v50, %v910_v48  ;;  %v1036_v62 = vstv %s1462_s25  ;;  %s426_s25 = scalar_lea.vmem [#allocation11], %s1427_s15  ;;  %s1835_s15 = sshll.u32 %s1960_s12, 4  ;;  %s1836_s15 = int_to_ptr.vmem [resolvable:$false] %s1835_s15 }
 0x1de   : > { %1724 = vtanh.f32 %v964_v53  ;;  %v1103_v53 = vrot.slane %v2352_v41, %v2254_v63  ;;  %v1117_v63 = vrot.slane %v2352_v41, %v2260_v6 }
 0x1df   : > { %1726 = vtanh.f32 %v978_v52  ;;  %v912_v61 = vadd.f32 %v911_v55, %v898_v54  ;;  %v1098_v52 = vpop.permute.xlu0 %1097  ;;  %v1089_v55 = vrot.slane %v2352_v41, %v2258_v4 }
 0x1e0   : > { %v986_v58 = vpop.permute.xlu1 %985 }
 0x1e1   : > { %v1719_v59 = vpop.eup %1718  ;;  %v992_v60 = vadd.f32 %v991_v57, %v986_v58 }
 0x1e2   : > { %v925_v0 = vmul.f32 %v1719_v59, %v924_v56  ;;  %v1721_v1 = vpop.eup %1720  ;;  %v1104_v59 = vadd.f32 %v1103_v53, %v1098_v52 }
 0x1e3   : > { %1728 = vtanh.f32 %v992_v60  ;;  %v939_v12 = vmul.f32 %v1721_v1, %v938_v2  ;;  %v1050_v1 = vstv %s1463_s18  ;;  %s1290_s18 = sshll.u32 %s426_s25, 4  ;;  %s1291_s18 = int_to_ptr.vmem [resolvable:$true] %s1290_s18 }
 0x1e4   : > { %v926_v7 = vadd.f32 %v925_v0, %v912_v61  ;;  %p1838_p13 = scmp.lt.s32.totalorder %s1291_s18, %s1836_s15 }
 0x1e5   : > { %v1000_v10 = vpop.permute.xlu1 %999 }
 0x1e6   : > { %v1723_v11 = vpop.eup %1722  ;;  %v1006_v16 = vadd.f32 %v1005_v8, %v1000_v10  ;;  %v940_v17 = vadd.f32 %v939_v12, %v926_v7  ;;  %v1140_v10 = vpop.permute.xlu0 %1139 }
 0x1e7   : > { %v953_v18 = vmul.f32 %v1723_v11, %v952_v9  ;;  %v1064_v9 = vstv %s2362_s29  ;;  %v1145_v11 = vrot.slane %v2352_v41, %v2266_v15 }
 0x1e8   : > { %1730 = vtanh.f32 %v1006_v16  ;;  %v1078_v16 = vstv %s1465_s28 }
 0x1e9   : > { %1732 = vtanh.f32 %v1020_v13  ;;  %v954_v25 = vadd.f32 %v953_v18, %v940_v17  ;;  %v1131_v13 = vrot.slane %v2352_v41, %v2264_v14 }
 0x1ea   : > { %v1028_v21 = vpop.permute.xlu1 %1027 }
 0x1eb   : > { %v1725_v23 = vpop.eup %1724  ;;  %v1034_v24 = vadd.f32 %v1033_v20, %v1028_v21 }
 0x1ec   : > { %v967_v28 = vmul.f32 %v1725_v23, %v966_v19  ;;  %v1727_v29 = vpop.eup %1726  ;;  %v1146_v19 = vadd.f32 %v1145_v11, %v1140_v10 }
 0x1ed   : > { %1734 = vtanh.f32 %v1034_v24  ;;  %v981_v38 = vmul.f32 %v1727_v29, %v980_v30  ;;  %v1092_v24 = vstv %s1466_s16  ;;  %s1288_s16 = scalar_lea.hbm %s2434_s9, %s1475_s19 }
 0x1ee   : > { %v968_v33 = vadd.f32 %v967_v28, %v954_v25  ;;  %v1159_v25 = vrot.slane %v2352_v41, %v2272_v22 }
 0x1ef   : > { %v1042_v36 = vpop.permute.xlu1 %1041 }
 0x1f0   : > { %v1729_v37 = vpop.eup %1728  ;;  %v1048_v42 = vadd.f32 %v1047_v34, %v1042_v36  ;;  %v982_v43 = vadd.f32 %v981_v38, %v968_v33  ;;  %v1173_v33 = vrot.slane %v2352_v41, %v2283_v27  ;;  %v1120_v36 = vstv %s1468_s5  ;;  %s1831_s5 = scalar_lea.vmem %s1291_s18, 128 }
 0x1f1   : > { %v995_v44 = vmul.f32 %v1729_v37, %v994_v35  ;;  %v1162_v27 = vstv %s1471_s17  ;;  %p1832_p9 = scmp.ne.s32.totalorder %s1291_s18, %s1831_s5 }
 0x1f2   : > { %1736 = vtanh.f32 %v1048_v42 }
 0x1f3   : > { %1738 = vtanh.f32 %v1062_v40  ;;  %v996_v48 = vadd.f32 %v995_v44, %v982_v43  ;;  %v1134_v43 = vstv %s1469_s13  ;;  %p1833_p11 = pnand %p1832_p9, %p2106_p7  ;;  %s1837_s13 = scalar_lea.vmem %s1836_s15, 256 }
 0x1f4   : > { %v1070_v39 = vpop.permute.xlu1 %1069  ;;  %p1839_p0 = scmp.lt.s32.totalorder %s1837_s13, %s1831_s5 }
 0x1f5   : > { %v1731_v47 = vpop.eup %1730  ;;  %v1076_v26 = vadd.f32 %v1075_v46, %v1070_v39  ;;  %p1834_p2 = pneg %p1833_p11 }
 0x1f6   : > { %v1009_v49 = vmul.f32 %v1731_v47, %v1008_v45  ;;  %v1733_v50 = vpop.eup %1732  ;;  %v1148_v47 = vstv %s1470_s20  ;;  %p1840_p5 = por %p1839_p0, %p1838_p13 }
 0x1f7   : > { %1740 = vtanh.f32 %v1076_v26  ;;  %v1023_v58 = vmul.f32 %v1733_v50, %v1022_v51  ;;  %v1176_v51 = vstv %s1472_s21 }
 0x1f8   : > { %v1010_v54 = vadd.f32 %v1009_v49, %v996_v48  ;;  %p1841_p10 = pnand %p1840_p5, %p1834_p2 }
 0x1f9   : > { %v1084_v56 = vpop.permute.xlu1 %1083 }
 0x1fa   : > { %v1735_v57 = vpop.eup %1734  ;;  %v1090_v60 = vadd.f32 %v1089_v55, %v1084_v56  ;;  %v1024_v61 = vadd.f32 %v1023_v58, %v1010_v54  ;;  %v1438_v56 = vld [vmem:[%s2432_s7] ss:$0 sm:$0xff] }
 0x1fb   : > { %v1037_v0 = vmul.f32 %v1735_v57, %v1036_v62  ;;  %v635_v57 = vpop.f32.mrf.mxu1 }
 0x1fc   : > { %1742 = vtanh.f32 %v1090_v60  ;;  %v636_v58 = vadd.f32 %v1438_v56, %v635_v57 }
 0x1fd   : > { %1744 = vtanh.f32 %v1104_v59  ;;  %v1038_v5 = vadd.f32 %v1037_v0, %v1024_v61  ;;  %v1523_v59 = vpop.f32.mrf.mxu1 }
 0x1fe   : > { %v1112_v2 = vpop.permute.xlu1 %1111  ;;  %639 = vst.msk [vmem:[#allocation3] sm:$0xff] %vm451_vm0, %v636_v58 }
 0x1ff   : > { %v1737_v4 = vpop.eup %1736  ;;  %v1118_v3 = vadd.f32 %v1117_v63, %v1112_v2 }
 0x200   : > { %v1051_v7 = vmul.f32 %v1737_v4, %v1050_v1  ;;  %v1739_v8 = vpop.eup %1738 }
 0x201   : > { %1746 = vtanh.f32 %v1118_v3  ;;  %v1065_v18 = vmul.f32 %v1739_v8, %v1064_v9 }
 0x202   : > { %v1052_v12 = vadd.f32 %v1051_v7, %v1038_v5 }
 0x203   : > { %v1126_v6 = vpop.permute.xlu1 %1125 }
 0x204   : > { %v1741_v17 = vpop.eup %1740  ;;  %v1132_v20 = vadd.f32 %v1131_v13, %v1126_v6  ;;  %v1066_v23 = vadd.f32 %v1065_v18, %v1052_v12 }
 0x205   : > { %v1079_v21 = vmul.f32 %v1741_v17, %v1078_v16  ;;  %v1194_v60 = vld [vmem:[#allocation3] sm:$0xff] }
 0x206   : > { %1748 = vtanh.f32 %v1132_v20  ;;  %1536 = vmatpush3.msra.mxu1 %v1194_v60 }
 0x207   : > { %1750 = vtanh.f32 %v1146_v19  ;;  %v1080_v30 = vadd.f32 %v1079_v21, %v1066_v23 }
 0x208   : > { %v1154_v15 = vpop.permute.xlu1 %1153 }
 0x209   : > { %v1743_v28 = vpop.eup %1742  ;;  %v1160_v29 = vadd.f32 %v1159_v25, %v1154_v15 }
 0x20a   : > { %v1093_v14 = vmul.f32 %v1743_v28, %v1092_v24  ;;  %v1745_v31 = vpop.eup %1744 }
 0x20b   : > { %1752 = vtanh.f32 %v1160_v29  ;;  %v1107_v22 = vmul.f32 %v1745_v31, %v1106_v32 }
 0x20c   : > { %v1094_v34 = vadd.f32 %v1093_v14, %v1080_v30 }
 0x20d   : > { %v1168_v35 = vpop.permute.xlu1 %1167 }
 0x20e   : > { %v1747_v37 = vpop.eup %1746  ;;  %v1174_v38 = vadd.f32 %v1173_v33, %v1168_v35  ;;  %v1108_v40 = vadd.f32 %v1107_v22, %v1094_v34 }
 0x20f   : > { %v1121_v42 = vmul.f32 %v1747_v37, %v1120_v36 }
 0x210   : > { %1754 = vtanh.f32 %v1174_v38 }
 0x211   : > { %v1122_v45 = vadd.f32 %v1121_v42, %v1108_v40 }
 0x213   : > { %v1749_v44 = vpop.eup %1748 }
 0x214   : > { %v1135_v46 = vmul.f32 %v1749_v44, %v1134_v43  ;;  %v1751_v39 = vpop.eup %1750 }
 0x215   : > { %v1149_v48 = vmul.f32 %v1751_v39, %v1148_v47 }
 0x216   : > { %v1136_v26 = vadd.f32 %v1135_v46, %v1122_v45 }
 0x218   : > { %v1753_v41 = vpop.eup %1752  ;;  %v1150_v49 = vadd.f32 %v1149_v48, %v1136_v26 }
 0x219   : > { %v1163_v50 = vmul.f32 %v1753_v41, %v1162_v27 }
 0x21b   : > { %v1164_v53 = vadd.f32 %v1163_v50, %v1150_v49 }
 0x21d   : > { %v1755_v52 = vpop.eup %1754 }
 0x21e   : > { %v1177_v54 = vmul.f32 %v1755_v52, %v1176_v51 }
 0x220   : > { %v1178_v55 = vadd.f32 %v1177_v54, %v1164_v53 }
 0x222   : > { %v1180_v62 = vsel %vm549_vm2, %v1178_v55, -inf }
 0x223   : > { %1181 = vmax.xlane.f32.xlu0 %v1180_v62 }
 0x2ac   : > { %v1182_v61 = vpop.xlane.xlu0 %1181 }
 0x2ad   : > { %v1186_v0 = vsub.f32 %v1178_v55, %v1182_v61  ;;  %v1183_v4 = vsub.f32 -inf, %v1182_v61 }
 0x2af   : > { %v1187_v1 = vmul.f32 1.442695, %v1186_v0  ;;  %v1184_v3 = vmul.f32 1.442695, %v1183_v4 }
 0x2b1   : > { %1756 = vpow2.f32 %v1187_v1 }
 0x2b2   : > { %1758 = vpow2.f32 %v1184_v3 }
 0x2be   : > { %v1757_v63 = vpop.eup %1756 }
 0x2bf   : > { %1538 = vmatmul.mubr.msk.f32.vlgmr.msra.gmra.mxu1 %vm549_vm2, %v1757_v63  ;;  %v1190_v2 = vsel %vm549_vm2, %v1757_v63, 0.0  ;;  %v1759_v5 = vpop.eup %1758 }
 0x2c0   : > { %1191 = vadd.xlane.f32.xlu1 %v1190_v2  ;;  %v1189_v8 = vmul.f32 0.0, %v1759_v5 }
 0x349   : > { %v1192_v7 = vpop.xlane.xlu1 %1191 }
 0x34a   : > { %v1193_v9 = vadd.f32 %v1192_v7, %v1189_v8 }
 0x34c   : > { %1760 = vrcp.f32 %v1193_v9 }
 0x359   : > { %v1761_v10 = vpop.eup %1760 }
 0x35a   : > { %v1270_v11 = vmul.f32 %v1761_v10, %v1193_v9 }
 0x35c   : > { %v1271_v12 = vsub.f32 2.0, %v1270_v11 }
 0x35e   : > { %v1272_v6 = vmul.f32 %v1761_v10, %v1271_v12 }
 0x37f   : > { %v1264_v13 = vpop.f32.mrf.mxu1 }
 0x380   : > { %v1268_v16 = vadd.f32 %v1264_v13, %v1189_v8 }
 0x381   : > { %v1539_v17 = vpop.f32.mrf.mxu1 }
 0x382   : > { %v1273_v18 = vmul.f32 %v1272_v6, %v1268_v16 }
 0x384   : > { %1274 = vst.msk [vmem:[%s426_s25] sm:$0xff] %vm451_vm0, %v1273_v18 }
 0x385   : > { %1844 = shalt.err (!%p1841_p10)
}
 0x386   : > { %s1845_s20 = scalar_lea.hbm %s1288_s16, 128  ;;  %s1849_s21 = scalar_lea.hbm %s2434_s9, 256 }
 0x387   : > { %p1846_p1 = scmp.ne.s32.totalorder %s1288_s16, %s1845_s20  ;;  %p1850_p12 = scmp.lt.s32.totalorder %s1288_s16, %s2434_s9 }
 0x388   : > { %p1851_p3 = scmp.lt.s32.totalorder %s1849_s21, %s1845_s20 }
 0x389   : > { %p1847_p4 = pnand %p1846_p1, %p2106_p7 }
 0x38a   : > { %p1852_p8 = por %p1851_p3, %p1850_p12 }
 0x38b   : > { %p1848_p6 = pneg %p1847_p4 }
 0x38d   : > { %p1853_p9 = pnand %p1852_p8, %p1848_p6 }
 0x38f   : > { %1856 = shalt.err (!%p1853_p9)
}
 0x390   : > { %1550 = dma.vmem_to_hbm [thread:$0]  (%p2106_p7), %s1291_s18, 128, %s1288_s16, %s1276_s26  }
 0x391 PF: > { %s2458_s19 = sld [smem:[#allocation17_spill]]  ;;  %s1302_s25 = sand.u32 1, %s1899_s30  }
 0x392   : > { %p2460_p2 = scmp.ge.s32.totalorder %s1919_s14, 2  ;;  %s1303_s29 = scalar_lea.sflag [#allocation6], %s1302_s25 }
 0x397   : > { %p2459_p11 = scmp.ne.s32.totalorder %s2458_s19, 0 }
 0x399   : > { %p1564_p13 = pnand %p2460_p2, %p2459_p11 }
 0x39b   : > { %p1565_p0 = pneg %p1564_p13 }
 0x39d   : > { %1894 = dma.done.wait (%p1565_p0), %s1303_s29, 128  }
 0x39e   : > { %1896 = vsyncadd (%p1565_p0), %s1303_s29, 4294967168  ;;  %s27_s14 = sadd.s32 1, %s1919_s14   ;;  %s2461_s12 = sld [smem:[#allocation16_spill]] }
 0x39f   : > { %p24_p5 = scmp.ge.s32.totalorder %s27_s14, 4   ;;  %s2462_s13 = sld [smem:[#allocation18_spill]] }
 0x3a0   : > { %s2463_s30 = smov %s1903_s10  ;;  %s2464_s10 = smov %s1907_s11 }
 0x3a1   : > { %s2465_s11 = smov %s2115_s22  ;;  %26 = sbr.rel (!%p24_p5) target bundleno = 11 (0xb), region = 120 }
 0x3a6   :  { %1308 = vsyncpa [#allocation5], 1 }
 0x3a7   :  { %1310 = vsyncpa [#allocation5 + $0x1], 1 }
 0x3a8   :  { %1311 = vsyncpa [#allocation9], 1 }
 0x3a9   :  { %1312 = vsyncpa [#allocation6], 1 }
 0x3aa   :  { %1314 = vsyncpa [#allocation6 + $0x1], 1 }
 0x3ab   :  { %1315 = vsyncpa [#allocation7], 1 }
 0x3ac   :  { %1317 = vsyncpa [#allocation7 + $0x1], 1 }

</bundles_post_ra>
